<compile_context>
chip_gen: v5e
topology: v5e:2x2
jax: 0.10.0
libtpu: 0.0.40
codegen_flags: <defaults>
</compile_context>

<pallas_src>
import functools

import numpy as np
import jax
import jax.numpy as jnp
from jax import lax
from jax.experimental import pallas as pl
from jax.experimental.pallas import tpu as pltpu

P4_DIM = 14
P4_USED = P4_DIM - 6          # counts for p4 values 6..13 -> 8 features per side
BN_EPS = 1e-5


def _round_up(x, m):
    return -(-x // m) * m


# ----------------------------- Pallas kernel ------------------------------- #
def linear_p4_kernel(codes_ref, table_ref, seg_ref, coef_ref,
                     policy_ref, vsum_ref, cnt_ref, *, bt, n, gh):
    """One grid step = bt batch elements, lanes ordered [side, batch_in_tile, pos].

    codes_ref : (1, 3, M) int32   row0 = pcode & 127, row1 = pcode >> 7, row2 = p4.
                                  pcode of masked / padded positions = sentinel E
                                  (zero table column).  M = 2*bt*n.
    table_ref : (3*gh, 128) bf16  regrouped table: row g*3+c = table[channel c,
                                  g*128:(g+1)*128] (zero sentinel + zero padding).
    seg_ref   : (M, Spad)   bf16  block diagonal: seg[m, s] = 1 iff m // n == s.
    coef_ref  : (2,) f32 (SMEM)   policy_stm_coef.
    policy_ref: (1, 1, bt*n) f32  combined policy map (lane dense).
    vsum_ref  : (1, 2, Spad) f32  value-component spatial sums per segment (side*bt+b).
    cnt_ref   : (1, 8, Spad) f32  p4 counts for values 6..13 per segment.
    """
    M = 2 * bt * n
    half = bt * n

    codes = codes_ref[0]                                   # (3, M) int32
    lo = codes[0:1]                                        # (1, M)
    hi = codes[1:2]                                        # (1, M)
    p4 = codes[2:3]                                        # (1, M)

    # ---- factored one-hot gather: low 128 on the MXU, high-group select on the VPU --
    onehot_lo = (lax.broadcasted_iota(jnp.int32, (128, M), 0)
                 == lo).astype(jnp.bfloat16)               # (128, M), exact 0/1
    partial = jnp.dot(table_ref[...], onehot_lo,
                      preferred_element_type=jnp.float32)  # (3*gh, M) f32

    if gh == 1:
        emb = partial                                      # hi == 0 for every index
    else:
        emb = partial[0:3] * (hi == 0).astype(jnp.float32)
        for g in range(1, gh):
            emb = emb + partial[3 * g:3 * g + 3] * (hi == g).astype(jnp.float32)
    # emb: (3, M) — rows (policy, value0, value1); masked/padded lanes are exactly 0.

    # ---- policy: side0 * coef0 + side1 * coef1 (static 128-aligned lane slices) ----
    pol = emb[0:1]                                         # (1, M)
    policy_ref[0] = pol[:, :half] * coef_ref[0] + pol[:, half:] * coef_ref[1]

    # ---- value sums + p4 counts: segmented sums as bf16 MXU matmuls (lane dense) ----
    seg = seg_ref[...]                                     # (M, Spad) bf16
    vsum_ref[0] = jnp.dot(emb[1:3].astype(jnp.bfloat16), seg,
                          preferred_element_type=jnp.float32)          # (2, Spad)
    vals = 6 + lax.broadcasted_iota(jnp.int32, (P4_USED, M), 0)
    eq = (vals == p4).astype(jnp.bfloat16)                 # (8, M), exact 0/1
    cnt_ref[0] = jnp.dot(eq, seg, preferred_element_type=jnp.float32)  # (8, Spad)


# ------------------------------- wrapper ------------------------------------ #
def fold_bn(p):
    """Fold eval-mode BatchNorm1d into the preceding Linear."""
    s = p["gamma"] / jnp.sqrt(p["var"] + BN_EPS)
    w = p["W"] * s[:, None]                                # (out, in)
    b = p["b"] * s + p["beta"] - p["mean"] * s             # (out,)
    return w, b


def _hw_profile():
    """(multi_core, per-step intermediate budget bytes, vmem_limit_bytes)."""
    kind = ""
    try:
        kind = jax.devices()[0].device_kind.lower()
    except Exception:
        pass
    if "v7" in kind or "7x" in kind:
        # 2 TensorCores, 64 MiB VMEM/core: >=2 (even) grid steps, conservative budget.
        return True, 10 * 2**20, 40 * 2**20
    if "v4" in kind or "v5p" in kind:
        # other megacore generations: shard the grid, plenty of VMEM.
        return True, 24 * 2**20, 64 * 2**20
    # v5e / v6e (single TensorCore, 128 MiB VMEM): large tiles, few grid steps.
    return False, 24 * 2**20, 64 * 2**20


def _step_vmem_bytes(bt, n_pad, gh):
    """Rough per-grid-step VMEM footprint (intermediates + pipeline buffers)."""
    m = 2 * bt * n_pad
    spad = max(128, _round_up(2 * bt, 128))
    b = 128 * m * 8            # low one-hot build (iota + compare + bf16)
    b += 3 * gh * m * 4        # gathered partials (f32)
    b += 3 * m * 8             # high-group selection temporaries
    b += 2 * 3 * m * 4         # packed codes input (double buffered, int32)
    b += 2 * m * spad * 2      # segment matrix (double buffered, bf16)
    b += 16 * m * 4            # emb / eq / policy temporaries (f32)
    b += 2 * (m // 2) * 4      # policy output (double buffered)
    b += 2 * 10 * spad * 4     # aux outputs (double buffered)
    return b


def _choose_tiling(B, n_pad, gh, multi_core, budget):
    """Pick (batch tile, grid size, padded batch)."""
    bt_cap = 1
    for cand in range(2, B + 1):
        if _step_vmem_bytes(cand, n_pad, gh) <= budget:
            bt_cap = cand
        else:
            break
    g = max(2 if multi_core else 1, -(-B // bt_cap))
    if multi_core and g % 2:
        g += 1                                   # balance both TensorCores
    bt = -(-B // g)                              # minimize batch padding
    return bt, g, g * bt


@jax.jit
def linear_p4countmlp_forward(sparse_feature_input, board_input, params):
    B, _, H, W = sparse_feature_input.shape
    N = H * W
    Np = max(128, _round_up(N, 128))                       # lane-dense position width

    # ---- embedding table: zero sentinel column, pad to 128 groups, bf16, regroup ----
    table_t = params["table"].T.astype(jnp.float32)        # (3, E)
    E = table_t.shape[1]                                   # sentinel index = E
    Ep = _round_up(E + 1, 128)
    Gh = Ep // 128
    table_rg = jnp.pad(table_t, ((0, 0), (0, Ep - E))).astype(jnp.bfloat16)
    table_rg = table_rg.reshape(3, Gh, 128).transpose(1, 0, 2).reshape(3 * Gh, 128)
    coef = params["coef"].astype(jnp.float32)              # (2,)

    multi_core, budget, vmem_limit = _hw_profile()
    Bt, G, B_pad = _choose_tiling(B, Np, Gh, multi_core, budget)
    M = 2 * Bt * Np
    S = 2 * Bt
    Spad = max(128, _round_up(S, 128))

    pcode = sparse_feature_input[:, 10:12].astype(jnp.int32).reshape(B, 2, N)
    p4 = sparse_feature_input[:, 8:10].astype(jnp.int32).reshape(B, 2, N)
    board2 = board_input[:, 0:2].astype(jnp.float32).reshape(B, 2, N)

    # masked_fill(non-empty) == gathering the all-zero sentinel column E.
    nonempty = (board2[:, 0] + board2[:, 1]) > 0.0         # (B, N)
    pcode = jnp.where(nonempty[:, None, :], E, pcode)

    # pad positions (sentinel / p4=0) and batch rows (results discarded in the end).
    pcode = jnp.pad(pcode, ((0, B_pad - B), (0, 0), (0, Np - N)), constant_values=E)
    p4 = jnp.pad(p4, ((0, B_pad - B), (0, 0), (0, Np - N)))
    lo = jnp.bitwise_and(pcode, 127)
    hi = jnp.right_shift(pcode, 7)

    def tile_flat(x):  # (B_pad, 2, Np) -> (G, M), lanes [side, batch_in_tile, pos]
        return x.reshape(G, Bt, 2, Np).transpose(0, 2, 1, 3).reshape(G, M)

    codes = jnp.stack([tile_flat(lo), tile_flat(hi), tile_flat(p4)], axis=1)  # (G,3,M)

    # block-diagonal segment matrix: seg[m, s] = 1 iff m // Np == s (s = side*Bt + b)
    seg = (jnp.arange(M, dtype=jnp.int32)[:, None] // Np
           == jnp.arange(Spad, dtype=jnp.int32)[None, :]).astype(jnp.bfloat16)

    policy_t, vsum_t, cnt_t = pl.pallas_call(
        functools.partial(linear_p4_kernel, bt=Bt, n=Np, gh=Gh),
        out_shape=(
            jax.ShapeDtypeStruct((G, 1, Bt * Np), jnp.float32),
            jax.ShapeDtypeStruct((G, 2, Spad), jnp.float32),
            jax.ShapeDtypeStruct((G, P4_USED, Spad), jnp.float32),
        ),
        grid=(G,),
        in_specs=[
            pl.BlockSpec((1, 3, M), lambda g: (g, 0, 0)),            # lo / hi / p4
            pl.BlockSpec((3 * Gh, 128), lambda g: (0, 0)),           # regrouped table
            pl.BlockSpec((M, Spad), lambda g: (0, 0)),               # segment matrix
            pl.BlockSpec(memory_space=pltpu.MemorySpace.SMEM),       # policy_stm_coef
        ],
        out_specs=(
            pl.BlockSpec((1, 1, Bt * Np), lambda g: (g, 0, 0)),
            pl.BlockSpec((1, 2, Spad), lambda g: (g, 0, 0)),
            pl.BlockSpec((1, P4_USED, Spad), lambda g: (g, 0, 0)),
        ),
        compiler_params=pltpu.CompilerParams(
            dimension_semantics=("parallel",),
            vmem_limit_bytes=vmem_limit),
    )(codes, table_rg, seg, coef)

    # ---- policy: (G, 1, Bt*Np) -> (B, H, W) ----
    policy = policy_t.reshape(B_pad, Np)[:B, :N].reshape(B, H, W)

    # ---- value from embedding sums: rows = comp, columns s = side*Bt + b ----
    vs = vsum_t[:, :, :S].reshape(G, 2, 2, Bt)             # [g, comp, side, b]
    win, loss = vs[:, 0, 0], vs[:, 0, 1]
    draw = vs[:, 1, 0] + vs[:, 1, 1]
    value = jnp.stack([win, loss, draw], axis=-1).reshape(B_pad, 3)[:B]

    # ---- p4 count features: rows = value class -> (B, 16), feature = side*8 + vc ----
    cs = cnt_t[:, :, :S].reshape(G, P4_USED, 2, Bt)        # [g, vc, side, b]
    counts = cs.transpose(0, 3, 2, 1).reshape(B_pad, 2 * P4_USED)[:B]

    # ---- 3-layer MLP head (folded Linear+BN, ReLU) as batched XLA matmuls ----
    w1, b1 = fold_bn(params["lin1"])
    w2, b2 = fold_bn(params["lin2"])
    w3, b3 = fold_bn(params["lin3"])
    h = jnp.maximum(counts @ w1.T + b1, 0.0)
    h = jnp.maximum(h @ w2.T + b2, 0.0)
    h = jnp.maximum(h @ w3.T + b3, 0.0)                    # (B, 2)

    value = value + jnp.stack([h[:, 0], h[:, 1], jnp.zeros_like(h[:, 0])], axis=1)
    return value, policy


# ------------------------- deterministic parameters ------------------------- #
def make_params(key, pcode_dim):
    ks = jax.random.split(key, 8)

    def linear_bn(k, fin, fout, wscale):
        k1, k2, k3, k4, k5, k6 = jax.random.split(k, 6)
        return dict(
            W=jax.random.normal(k1, (fout, fin), jnp.float32) * wscale,
            b=jax.random.normal(k2, (fout,), jnp.float32) * 0.01,
            gamma=1.0 + 0.1 * jax.random.normal(k3, (fout,), jnp.float32),
            beta=0.1 * jax.random.normal(k4, (fout,), jnp.float32),
            mean=0.1 * jax.random.normal(k5, (fout,), jnp.float32),
            var=jax.random.uniform(k6, (fout,), jnp.float32, 0.5, 1.5),
        )

    return dict(
        table=jax.random.normal(ks[0], (pcode_dim, 3), jnp.float32) * 0.05,
        coef=1.0 + 0.5 * jax.random.normal(ks[1], (2,), jnp.float32),
        lin1=linear_bn(ks[2], 16, 16, 0.02),
        lin2=linear_bn(ks[3], 16, 16, 0.1),
        lin3=linear_bn(ks[4], 16, 2, 0.1),
    )


# ----------------------------- pure-JAX reference --------------------------- #
def ref_linear_block(x, p):
    y = x @ p["W"].T + p["b"]
    y = (y - p["mean"]) / jnp.sqrt(p["var"] + BN_EPS) * p["gamma"] + p["beta"]
    return jnp.maximum(y, 0.0)


def reference_forward(sparse, board, params):
    B = sparse.shape[0]
    table, coef = params["table"], params["coef"]
    pcode = sparse[:, 10:12].astype(jnp.int32)             # (B,2,H,W)
    emb = table[pcode]                                     # (B,2,H,W,3)
    policy_map = emb[..., 0]
    value_map = emb[..., 1:]
    mask = (board[:, 0] + board[:, 1]) > 0                 # (B,H,W)
    mask1 = mask[:, None]                                  # (B,1,H,W)
    value_map = jnp.where(mask1[..., None], 0.0, value_map)
    policy_map = jnp.where(mask1, 0.0, policy_map)
    value = value_map.sum(axis=(2, 3))                     # (B,2,2)
    win, loss = value[:, 0, 0], value[:, 1, 0]
    draw = value[:, 0, 1] + value[:, 1, 1]
    value = jnp.stack([win, loss, draw], axis=1)
    policy = policy_map[:, 0] * coef[0] + policy_map[:, 1] * coef[1]

    p4 = sparse[:, 8:10].astype(jnp.int32)                 # (B,2,H,W)
    counts = jnp.stack(
        [jnp.sum((p4 == v).astype(jnp.float32), axis=(2, 3)) for v in range(6, P4_DIM)],
        axis=-1)                                           # (B,2,8)
    x = counts.reshape(B, 2 * P4_USED)
    h = ref_linear_block(x, params["lin1"])
    h = ref_linear_block(h, params["lin2"])
    h = ref_linear_block(h, params["lin3"])                # (B,2)
    value = value + jnp.stack([h[:, 0], h[:, 1], jnp.zeros_like(h[:, 0])], axis=1)
    return value, policy


# ----------------------------------- main ------------------------------------ #
if __name__ == "__main__":
    B, H, W = 2, 16, 16
    PCODE_DIM = 300   # small synthetic pcode vocabulary (module default is 2380);
                      # chosen > 128 so the factored (hi, lo) gather path is exercised.

    key = jax.random.PRNGKey(0)
    k_p4, k_pcode, k_board, k_params = jax.random.split(key, 4)

    sparse = jnp.zeros((B, 12, H, W), jnp.int32)
    sparse = sparse.at[:, 8:10].set(
        jax.random.randint(k_p4, (B, 2, H, W), 0, P4_DIM))
    sparse = sparse.at[:, 10:12].set(
        jax.random.randint(k_pcode, (B, 2, H, W), 0, PCODE_DIM))

    board = (jax.random.uniform(k_board, (B, 2, H, W)) < 0.4).astype(jnp.float32)

    params = make_params(k_params, PCODE_DIM)

    value, policy = linear_p4countmlp_forward(sparse, board, params)
    value = jax.block_until_ready(value)
    policy = jax.block_until_ready(policy)

    ref_value, ref_policy = reference_forward(sparse, board, params)
    assert value.shape == (B, 3) and policy.shape == (B, H, W)
    np.testing.assert_allclose(np.asarray(value), np.asarray(ref_value),
                               rtol=5e-2, atol=5e-2)
    np.testing.assert_allclose(np.asarray(policy), np.asarray(ref_policy),
                               rtol=5e-2, atol=5e-2)

    print("KERNEL_OK")
</pallas_src>

<mosaic_0001>
module attributes {stable_mosaic.version = 11 : i64} {
  func.func @linear_p4_kernel(%arg0: i32, %arg1: memref<1x3x1024xi32, #tpu.memory_space<vmem>>, %arg2: memref<9x128xbf16, #tpu.memory_space<vmem>>, %arg3: memref<1024x128xbf16, #tpu.memory_space<vmem>>, %arg4: memref<2xf32, #tpu.memory_space<smem>>, %arg5: memref<1x1x512xf32, #tpu.memory_space<vmem>>, %arg6: memref<1x2x128xf32, #tpu.memory_space<vmem>>, %arg7: memref<1x8x128xf32, #tpu.memory_space<vmem>>) attributes {dimension_semantics = [#tpu.dimension_semantics<parallel>], iteration_bounds = array<i64: 1>, scalar_prefetch = 0 : i64, scratch_operands = 0 : i64, tpu.core_type = #tpu.core_type<tc>, window_params = [{transform_indices = @transform_0, window_bounds = array<i64: 1, 3, 1024>}, {pipeline_mode = #tpu.pipeline_mode<synchronous>, transform_indices = @transform_1, window_bounds = array<i64: 9, 128>}, {pipeline_mode = #tpu.pipeline_mode<synchronous>, transform_indices = @transform_2, window_bounds = array<i64: 1024, 128>}, {transform_indices = @transform_3, window_bounds = array<i64: 2>}, {transform_indices = @transform_4, window_bounds = array<i64: 1, 1, 512>}, {transform_indices = @transform_5, window_bounds = array<i64: 1, 2, 128>}, {transform_indices = @transform_6, window_bounds = array<i64: 1, 8, 128>}]} {
    %c0 = arith.constant 0 : index
    %c0_0 = arith.constant 0 : index
    %c0_1 = arith.constant 0 : index
    %0 = vector.load %arg1[%c0, %c0_0, %c0_1] : memref<1x3x1024xi32, #tpu.memory_space<vmem>>, vector<1x3x1024xi32>
    %1 = vector.shape_cast %0 : vector<1x3x1024xi32> to vector<3x1024xi32>
    %2 = vector.extract_strided_slice %1 {offsets = [0, 0], sizes = [1, 1024], strides = [1, 1]} : vector<3x1024xi32> to vector<1x1024xi32>
    %3 = vector.extract_strided_slice %1 {offsets = [1, 0], sizes = [1, 1024], strides = [1, 1]} : vector<3x1024xi32> to vector<1x1024xi32>
    %4 = vector.extract_strided_slice %1 {offsets = [2, 0], sizes = [1, 1024], strides = [1, 1]} : vector<3x1024xi32> to vector<1x1024xi32>
    %5 = tpu.iota {dimensions = array<i32: 0>} : vector<128x1024xi32>
    %6 = vector.broadcast %2 : vector<1x1024xi32> to vector<128x1024xi32>
    %7 = arith.cmpi eq, %5, %6 : vector<128x1024xi32>
    %8 = arith.extui %7 : vector<128x1024xi1> to vector<128x1024xi32>
    %9 = arith.sitofp %8 : vector<128x1024xi32> to vector<128x1024xf32>
    %10 = arith.truncf %9 : vector<128x1024xf32> to vector<128x1024xbf16>
    %c0_2 = arith.constant 0 : index
    %c0_3 = arith.constant 0 : index
    %11 = vector.load %arg2[%c0_2, %c0_3] : memref<9x128xbf16, #tpu.memory_space<vmem>>, vector<9x128xbf16>
    %cst = arith.constant dense<0.000000e+00> : vector<9x1024xf32>
    %12 = tpu.matmul %11, %10, %cst {dimension_numbers = #tpu.dot_dimension_numbers<[1], [0], [0], [1], [0, 0, 1, 1], [], []>} : vector<9x128xbf16>, vector<128x1024xbf16>, vector<9x1024xf32> -> vector<9x1024xf32>
    %13 = vector.extract_strided_slice %12 {offsets = [0, 0], sizes = [3, 1024], strides = [1, 1]} : vector<9x1024xf32> to vector<3x1024xf32>
    %c0_i32 = arith.constant 0 : i32
    %14 = vector.broadcast %c0_i32 : i32 to vector<1x1024xi32>
    %15 = arith.cmpi eq, %3, %14 : vector<1x1024xi32>
    %16 = arith.extui %15 : vector<1x1024xi1> to vector<1x1024xi32>
    %17 = arith.sitofp %16 : vector<1x1024xi32> to vector<1x1024xf32>
    %18 = vector.broadcast %17 : vector<1x1024xf32> to vector<3x1024xf32>
    %19 = arith.mulf %13, %18 : vector<3x1024xf32>
    %20 = vector.extract_strided_slice %12 {offsets = [3, 0], sizes = [3, 1024], strides = [1, 1]} : vector<9x1024xf32> to vector<3x1024xf32>
    %c1_i32 = arith.constant 1 : i32
    %21 = vector.broadcast %c1_i32 : i32 to vector<1x1024xi32>
    %22 = arith.cmpi eq, %3, %21 : vector<1x1024xi32>
    %23 = arith.extui %22 : vector<1x1024xi1> to vector<1x1024xi32>
    %24 = arith.sitofp %23 : vector<1x1024xi32> to vector<1x1024xf32>
    %25 = vector.broadcast %24 : vector<1x1024xf32> to vector<3x1024xf32>
    %26 = arith.mulf %20, %25 : vector<3x1024xf32>
    %27 = arith.addf %19, %26 : vector<3x1024xf32>
    %28 = vector.extract_strided_slice %12 {offsets = [6, 0], sizes = [3, 1024], strides = [1, 1]} : vector<9x1024xf32> to vector<3x1024xf32>
    %c2_i32 = arith.constant 2 : i32
    %29 = vector.broadcast %c2_i32 : i32 to vector<1x1024xi32>
    %30 = arith.cmpi eq, %3, %29 : vector<1x1024xi32>
    %31 = arith.extui %30 : vector<1x1024xi1> to vector<1x1024xi32>
    %32 = arith.sitofp %31 : vector<1x1024xi32> to vector<1x1024xf32>
    %33 = vector.broadcast %32 : vector<1x1024xf32> to vector<3x1024xf32>
    %34 = arith.mulf %28, %33 : vector<3x1024xf32>
    %35 = arith.addf %27, %34 : vector<3x1024xf32>
    %36 = vector.extract_strided_slice %35 {offsets = [0, 0], sizes = [1, 1024], strides = [1, 1]} : vector<3x1024xf32> to vector<1x1024xf32>
    %37 = vector.extract_strided_slice %36 {offsets = [0, 0], sizes = [1, 512], strides = [1, 1]} : vector<1x1024xf32> to vector<1x512xf32>
    %c0_4 = arith.constant 0 : index
    %38 = memref.load %arg4[%c0_4] : memref<2xf32, #tpu.memory_space<smem>>
    %39 = vector.broadcast %38 : f32 to vector<1x512xf32>
    %40 = arith.mulf %37, %39 : vector<1x512xf32>
    %41 = vector.extract_strided_slice %36 {offsets = [0, 512], sizes = [1, 512], strides = [1, 1]} : vector<1x1024xf32> to vector<1x512xf32>
    %c1 = arith.constant 1 : index
    %42 = memref.load %arg4[%c1] : memref<2xf32, #tpu.memory_space<smem>>
    %43 = vector.broadcast %42 : f32 to vector<1x512xf32>
    %44 = arith.mulf %41, %43 : vector<1x512xf32>
    %45 = arith.addf %40, %44 : vector<1x512xf32>
    %c0_5 = arith.constant 0 : index
    %c0_6 = arith.constant 0 : index
    %c0_7 = arith.constant 0 : index
    %46 = vector.load %arg5[%c0_5, %c0_6, %c0_7] : memref<1x1x512xf32, #tpu.memory_space<vmem>>, vector<1x1x512xf32>
    %47 = vector.shape_cast %46 : vector<1x1x512xf32> to vector<1x512xf32>
    %48 = vector.shape_cast %45 : vector<1x512xf32> to vector<1x1x512xf32>
    tpu.vector_store %arg5[%c0_5, %c0_6, %c0_7], %48 {strides = array<i32>} : memref<1x1x512xf32, #tpu.memory_space<vmem>>, vector<1x1x512xf32>,
    %c0_8 = arith.constant 0 : index
    %c0_9 = arith.constant 0 : index
    %49 = vector.load %arg3[%c0_8, %c0_9] : memref<1024x128xbf16, #tpu.memory_space<vmem>>, vector<1024x128xbf16>
    %50 = vector.extract_strided_slice %35 {offsets = [1, 0], sizes = [2, 1024], strides = [1, 1]} : vector<3x1024xf32> to vector<2x1024xf32>
    %51 = arith.truncf %50 : vector<2x1024xf32> to vector<2x1024xbf16>
    %cst_10 = arith.constant dense<0.000000e+00> : vector<2x128xf32>
    %52 = tpu.matmul %51, %49, %cst_10 {dimension_numbers = #tpu.dot_dimension_numbers<[1], [0], [0], [1], [0, 0, 1, 1], [], []>} : vector<2x1024xbf16>, vector<1024x128xbf16>, vector<2x128xf32> -> vector<2x128xf32>
    %c0_11 = arith.constant 0 : index
    %c0_12 = arith.constant 0 : index
    %c0_13 = arith.constant 0 : index
    %53 = vector.load %arg6[%c0_11, %c0_12, %c0_13] : memref<1x2x128xf32, #tpu.memory_space<vmem>>, vector<1x2x128xf32>
    %54 = vector.shape_cast %53 : vector<1x2x128xf32> to vector<2x128xf32>
    %55 = vector.shape_cast %52 : vector<2x128xf32> to vector<1x2x128xf32>
    tpu.vector_store %arg6[%c0_11, %c0_12, %c0_13], %55 {strides = array<i32>} : memref<1x2x128xf32, #tpu.memory_space<vmem>>, vector<1x2x128xf32>,
    %56 = tpu.iota {dimensions = array<i32: 0>} : vector<8x1024xi32>
    %c6_i32 = arith.constant 6 : i32
    %57 = vector.broadcast %c6_i32 : i32 to vector<8x1024xi32>
    %58 = arith.addi %57, %56 : vector<8x1024xi32>
    %59 = vector.broadcast %4 : vector<1x1024xi32> to vector<8x1024xi32>
    %60 = arith.cmpi eq, %58, %59 : vector<8x1024xi32>
    %61 = arith.extui %60 : vector<8x1024xi1> to vector<8x1024xi32>
    %62 = arith.sitofp %61 : vector<8x1024xi32> to vector<8x1024xf32>
    %63 = arith.truncf %62 : vector<8x1024xf32> to vector<8x1024xbf16>
    %cst_14 = arith.constant dense<0.000000e+00> : vector<8x128xf32>
    %64 = tpu.matmul %63, %49, %cst_14 {dimension_numbers = #tpu.dot_dimension_numbers<[1], [0], [0], [1], [0, 0, 1, 1], [], []>} : vector<8x1024xbf16>, vector<1024x128xbf16>, vector<8x128xf32> -> vector<8x128xf32>
    %c0_15 = arith.constant 0 : index
    %c0_16 = arith.constant 0 : index
    %c0_17 = arith.constant 0 : index
    %65 = vector.load %arg7[%c0_15, %c0_16, %c0_17] : memref<1x8x128xf32, #tpu.memory_space<vmem>>, vector<1x8x128xf32>
    %66 = vector.shape_cast %65 : vector<1x8x128xf32> to vector<8x128xf32>
    %67 = vector.shape_cast %64 : vector<8x128xf32> to vector<1x8x128xf32>
    tpu.vector_store %arg7[%c0_15, %c0_16, %c0_17], %67 {strides = array<i32>} : memref<1x8x128xf32, #tpu.memory_space<vmem>>, vector<1x8x128xf32>,
    return
  }
  func.func @transform_0(%arg0: i32) -> (i32, i32, i32) {
    %c0_i32 = arith.constant 0 : i32
    %c0_i32_0 = arith.constant 0 : i32
    %c0_i32_1 = arith.constant 0 : i32
    return %arg0, %c0_i32, %c0_i32_0 : i32, i32, i32
  }
  func.func @transform_1(%arg0: i32) -> (i32, i32) {
    %c0_i32 = arith.constant 0 : i32
    %c0_i32_0 = arith.constant 0 : i32
    %c0_i32_1 = arith.constant 0 : i32
    return %c0_i32, %c0_i32_0 : i32, i32
  }
  func.func @transform_2(%arg0: i32) -> (i32, i32) {
    %c0_i32 = arith.constant 0 : i32
    %c0_i32_0 = arith.constant 0 : i32
    %c0_i32_1 = arith.constant 0 : i32
    return %c0_i32, %c0_i32_0 : i32, i32
  }
  func.func @transform_3(%arg0: i32) -> i32 {
    %c0_i32 = arith.constant 0 : i32
    %c0_i32_0 = arith.constant 0 : i32
    return %c0_i32 : i32
  }
  func.func @transform_4(%arg0: i32) -> (i32, i32, i32) {
    %c0_i32 = arith.constant 0 : i32
    %c0_i32_0 = arith.constant 0 : i32
    %c0_i32_1 = arith.constant 0 : i32
    return %arg0, %c0_i32, %c0_i32_0 : i32, i32, i32
  }
  func.func @transform_5(%arg0: i32) -> (i32, i32, i32) {
    %c0_i32 = arith.constant 0 : i32
    %c0_i32_0 = arith.constant 0 : i32
    %c0_i32_1 = arith.constant 0 : i32
    return %arg0, %c0_i32, %c0_i32_0 : i32, i32, i32
  }
  func.func @transform_6(%arg0: i32) -> (i32, i32, i32) {
    %c0_i32 = arith.constant 0 : i32
    %c0_i32_0 = arith.constant 0 : i32
    %c0_i32_1 = arith.constant 0 : i32
    return %arg0, %c0_i32, %c0_i32_0 : i32, i32, i32
  }
}

</mosaic_0001>

<bundles_post_ra>
// kernel: linear_p4countmlp_forward.1
= control target key start
LH: loop header
LB: loop body
LE: loop exit
PB: predicated region body
PF: predicated region fallthrough
CT: control target
= control target key end

     0   :  { %12 = vsyncpa [#allocation3], 0  ;;  %s2408_s24 = smov [#allocation2]   ;;  %s3455_s0 = inlined_call_operand.vmem [shape: s32[1,3,1024], index: 0, kind: input, shape index: {}]   ;;  %s3456_s1 = inlined_call_operand.vmem [shape: bf16[9,128], index: 1, kind: input, shape index: {}]   ;;  %s3457_s2 = inlined_call_operand.vmem [shape: bf16[1024,128], index: 2, kind: input, shape index: {}]   ;;  %s3458_s3 = inlined_call_operand.vmem [shape: f32[2], index: 3, kind: input, shape index: {}]   ;;  %s3459_s4 = inlined_call_operand.vmem [shape: f32[1,1,512], index: 4, kind: output, shape index: {0}]   ;;  %s3460_s5 = inlined_call_operand.vmem [shape: f32[1,2,128], index: 5, kind: output, shape index: {1}]   ;;  %s3461_s6 = inlined_call_operand.vmem [shape: f32[1,8,128], index: 6, kind: output, shape index: {2}]  }
   0x1   :  { %s24_s23 = sshll.u32 %s3458_s3, 4  ;;  %s25_s23 = int_to_ptr.vmem [resolvable:$true] %s24_s23 }
   0x2   :  { %27 = dma.vmem_to_smem %s25_s23, 16, %s2408_s24, [#allocation3]  }
   0x3   :  { %2406 = dma.done.wait [#allocation3], 16  }
   0x4   :  { %2407 = vsyncadd [#allocation3], 4294967280 }
   0x5   :  { %32 = sfence }
   0x6   :  { %v2452_v0 = vld [vmem:[%s3455_s0] sm:$0x77]  ;;  %v3464_v1 = vlaneseq  ;;  %v2457_v2 = vld [vmem:[%s3455_s0 + $0x8] sm:$0x77]  ;;  %v3462_v16 = vmov 1.0|1.0  }
   0x7   :  { %v54_v3 = vperm.slane %v2452_v0, 0  ;;  %v55_v4 = vperm.slane %v2452_v0, 4  ;;  %v56_v5 = vperm.slane %v2457_v2, 0  ;;  %v57_v6 = vperm.slane %v2457_v2, 4  ;;  %v2625_v27 = vld [vmem:[%s3455_s0 + $0x10] sm:$0x77] }
   0x8   :  { %v2464_v7 = vshrl.u32 %v3464_v1, 7  ;;  %v2640_v28 = vld [vmem:[%s3455_s0 + $0x18] sm:$0x77]  ;;  %v58_v30 = vperm.slane %v2625_v27, 0  ;;  %v59_v31 = vperm.slane %v2625_v27, 4  ;;  %v2917_v44 = vld [vmem:[%s3457_s2 + $0x30] sm:$0xff] }
   0x9   :  { %v2466_v8 = vperm.slane %v54_v3, 0  ;;  %v2468_v9 = vperm.slane %v55_v4, 0  ;;  %v2470_v10 = vperm.slane %v56_v5, 0  ;;  %v2472_v11 = vperm.slane %v57_v6, 0  ;;  %v1899_v35 = vld [vmem:[%s3456_s1] sm:$0xf] }
   0xa   :  { %3506 = vst [vmem:[#allocation5_spill] sm:$0xff] %v2464_v7  ;;  %v2475_v12 = vadd.s32 112, %v2464_v7  ;;  %v2478_v13 = vadd.s32 120, %v2464_v7  ;;  %v2481_v14 = vadd.s32 96, %v2464_v7  ;;  %v2484_v15 = vadd.s32 104, %v2464_v7  ;;  %v2889_v41 = vld [vmem:[%s3457_s2 + $0x38] sm:$0xff] }
   0xb   :  { %v2508_v17 = vadd.s32 80, %v2464_v7  ;;  %v2511_v18 = vadd.s32 88, %v2464_v7  ;;  %v2534_v19 = vadd.s32 64, %v2464_v7  ;;  %v2537_v20 = vadd.s32 72, %v2464_v7  ;;  %v2322_v36 = vld [vmem:[%s3456_s1] sm:$0x10] }
   0xc   :  { %vm182_vm0 = vcmp.eq.s32.totalorder %v2475_v12, %v2466_v8  ;;  %vm190_vm1 = vcmp.eq.s32.totalorder %v2478_v13, %v2466_v8  ;;  %vm183_vm2 = vcmp.eq.s32.totalorder %v2475_v12, %v2468_v9  ;;  %vm191_vm3 = vcmp.eq.s32.totalorder %v2478_v13, %v2468_v9  ;;  %v2899_v42 = vld [vmem:[%s3457_s2 + $0x78] sm:$0xff]  ;;  %v2924_v45 = vld [vmem:[%s3457_s2 + $0x70] sm:$0xff]  ;;  %v2945_v48 = vld [vmem:[%s3457_s2 + $0x28] sm:$0xff]  ;;  %s3347_s10 = sld [smem:[#allocation2 + $0x1]] }
   0xd   :  { %vm1901_vm4 = vmpackc.low %vm190_vm1, %vm182_vm0  ;;  %vm184_vm5 = vcmp.eq.s32.totalorder %v2475_v12, %v2470_v10  ;;  %vm192_vm6 = vcmp.eq.s32.totalorder %v2478_v13, %v2470_v10  ;;  %vm185_vm7 = vcmp.eq.s32.totalorder %v2475_v12, %v2472_v11  ;;  %vm193_vm8 = vcmp.eq.s32.totalorder %v2478_v13, %v2472_v11  ;;  %v2910_v43 = vld [vmem:[%s3457_s2 + $0xb8] sm:$0xff]  ;;  %v2938_v47 = vld [vmem:[%s3457_s2 + $0xb0] sm:$0xff] }
   0xe   :  { %1902 = vmatpush.bf16.msk.msra.mxu0 %vm1901_vm4, %v3462_v16  ;;  %vm1917_vm9 = vmpackc.low %vm191_vm3, %vm183_vm2  ;;  %vm166_vm10 = vcmp.eq.s32.totalorder %v2481_v14, %v2466_v8  ;;  %vm174_vm11 = vcmp.eq.s32.totalorder %v2484_v15, %v2466_v8  ;;  %vm167_vm13 = vcmp.eq.s32.totalorder %v2481_v14, %v2468_v9  ;;  %vm175_vm14 = vcmp.eq.s32.totalorder %v2484_v15, %v2468_v9  ;;  %v2931_v46 = vld [vmem:[%s3457_s2 + $0xf8] sm:$0xff]  ;;  %v2952_v49 = vld [vmem:[%s3457_s2 + $0x68] sm:$0xff] }
   0xf   :  { %1918 = vmatpush.bf16.msk.msra.mxu1 %vm1917_vm9, %v3462_v16  ;;  %vm1933_vm12 = vmpackc.low %vm192_vm6, %vm184_vm5  ;;  %vm168_vm0 = vcmp.eq.s32.totalorder %v2481_v14, %v2470_v10  ;;  %vm176_vm1 = vcmp.eq.s32.totalorder %v2484_v15, %v2470_v10  ;;  %vm169_vm3 = vcmp.eq.s32.totalorder %v2481_v14, %v2472_v11  ;;  %vm177_vm4 = vcmp.eq.s32.totalorder %v2484_v15, %v2472_v11  ;;  %v2958_v50 = vld [vmem:[%s3457_s2 + $0xf0] sm:$0xff]  ;;  %v2964_v51 = vld [vmem:[%s3457_s2 + $0xa8] sm:$0xff] }
  0x10   :  { %1934 = vmatpush.bf16.msk.msra.mxu2 %vm1933_vm12, %v3462_v16  ;;  %vm1949_vm15 = vmpackc.low %vm193_vm8, %vm185_vm7  ;;  %vm150_vm6 = vcmp.eq.s32.totalorder %v2508_v17, %v2466_v8  ;;  %vm158_vm7 = vcmp.eq.s32.totalorder %v2511_v18, %v2466_v8  ;;  %vm151_vm9 = vcmp.eq.s32.totalorder %v2508_v17, %v2468_v9  ;;  %vm152_vm12 = vcmp.eq.s32.totalorder %v2508_v17, %v2470_v10  ;;  %v2970_v52 = vld [vmem:[%s3457_s2 + $0x20] sm:$0xff]  ;;  %v2982_v54 = vld [vmem:[%s3457_s2 + $0xe8] sm:$0xff] }
  0x11   :  { %1950 = vmatpush.bf16.msk.msra.mxu3 %vm1949_vm15, %v3462_v16  ;;  %vm1903_vm2 = vmpackc.low %vm174_vm11, %vm166_vm10  ;;  %vm159_vm10 = vcmp.eq.s32.totalorder %v2511_v18, %v2468_v9  ;;  %vm153_vm15 = vcmp.eq.s32.totalorder %v2508_v17, %v2472_v11  ;;  %v2560_v21 = vadd.s32 48, %v2464_v7  ;;  %v2563_v22 = vadd.s32 56, %v2464_v7  ;;  %v2976_v53 = vld [vmem:[%s3457_s2 + $0x60] sm:$0xff]  ;;  %v2994_v56 = vld [vmem:[%s3457_s2 + $0x18] sm:$0xff] }
  0x12   :  { %1904 = vmatpush.bf16.msk.msra.mxu0 %vm1903_vm2, %v3462_v16  ;;  %vm1919_vm5 = vmpackc.low %vm175_vm14, %vm167_vm13  ;;  %vm160_vm13 = vcmp.eq.s32.totalorder %v2511_v18, %v2470_v10  ;;  %vm134_vm2 = vcmp.eq.s32.totalorder %v2534_v19, %v2466_v8  ;;  %v2586_v23 = vadd.s32 32, %v2464_v7  ;;  %v2589_v24 = vadd.s32 40, %v2464_v7  ;;  %v2988_v55 = vld [vmem:[%s3457_s2 + $0xa0] sm:$0xff]  ;;  %v3000_v57 = vld [vmem:[%s3457_s2 + $0x58] sm:$0xff] }
  0x13   :  { %1920 = vmatpush.bf16.msk.msra.mxu1 %vm1919_vm5, %v3462_v16  ;;  %vm1935_vm8 = vmpackc.low %vm176_vm1, %vm168_vm0  ;;  %vm161_vm0 = vcmp.eq.s32.totalorder %v2511_v18, %v2472_v11  ;;  %vm135_vm5 = vcmp.eq.s32.totalorder %v2534_v19, %v2468_v9  ;;  %v2612_v25 = vadd.s32 16, %v2464_v7  ;;  %v2615_v26 = vadd.s32 24, %v2464_v7  ;;  %v3006_v58 = vld [vmem:[%s3457_s2 + $0xe0] sm:$0xff]  ;;  %v3012_v59 = vld [vmem:[%s3457_s2 + $0x98] sm:$0xff] }
  0x14   :  { %1936 = vmatpush.bf16.msk.msra.mxu2 %vm1935_vm8, %v3462_v16  ;;  %vm1951_vm11 = vmpackc.low %vm177_vm4, %vm169_vm3  ;;  %vm142_vm3 = vcmp.eq.s32.totalorder %v2537_v20, %v2466_v8  ;;  %vm136_vm8 = vcmp.eq.s32.totalorder %v2534_v19, %v2470_v10  ;;  %v2648_v29 = vadd.s32 8, %v2464_v7  ;;  %v60_v32 = vperm.slane %v2640_v28, 0  ;;  %v3018_v60 = vld [vmem:[%s3457_s2 + $0x10] sm:$0xff]  ;;  %v3030_v62 = vld [vmem:[%s3457_s2 + $0xd8] sm:$0xff] }
  0x15   :  { %1952 = vmatpush.bf16.msk.msra.mxu3 %vm1951_vm11, %v3462_v16  ;;  %vm1905_vm14 = vmpackc.low %vm158_vm7, %vm150_vm6  ;;  %vm143_vm6 = vcmp.eq.s32.totalorder %v2537_v20, %v2468_v9  ;;  %vm137_vm11 = vcmp.eq.s32.totalorder %v2534_v19, %v2472_v11  ;;  %v61_v33 = vperm.slane %v2640_v28, 4  ;;  %v2680_v34 = vperm.slane %v58_v30, 0  ;;  %v3024_v61 = vld [vmem:[%s3457_s2 + $0x50] sm:$0xff]  ;;  %v3042_v3 = vld [vmem:[%s3457_s2 + $0x8] sm:$0xff] }
  0x16   :  { %1906 = vmatpush.bf16.msk.msra.mxu0 %vm1905_vm14, %v3462_v16  ;;  %vm1921_vm1 = vmpackc.low %vm159_vm10, %vm151_vm9  ;;  %vm144_vm9 = vcmp.eq.s32.totalorder %v2537_v20, %v2470_v10  ;;  %vm118_vm14 = vcmp.eq.s32.totalorder %v2560_v21, %v2466_v8  ;;  %v2699_v37 = vperm.slane %v59_v31, 0  ;;  %v2712_v38 = vperm.slane %v60_v32, 0  ;;  %v3036_v63 = vld [vmem:[%s3457_s2 + $0x90] sm:$0xff]  ;;  %v3048_v4 = vld [vmem:[%s3457_s2 + $0x48] sm:$0xff] }
  0x17   :  { %1922 = vmatpush.bf16.msk.msra.mxu1 %vm1921_vm1, %v3462_v16  ;;  %vm1937_vm4 = vmpackc.low %vm160_vm13, %vm152_vm12  ;;  %vm145_vm12 = vcmp.eq.s32.totalorder %v2537_v20, %v2472_v11  ;;  %vm119_vm1 = vcmp.eq.s32.totalorder %v2560_v21, %v2468_v9  ;;  %v2725_v39 = vperm.slane %v61_v33, 0  ;;  %v2727_v40 = vor.u32 %v2322_v36, %v1899_v35  ;;  %v3054_v5 = vld [vmem:[%s3457_s2 + $0xd0] sm:$0xff]  ;;  %v3060_v6 = vld [vmem:[%s3457_s2 + $0x88] sm:$0xff] }
  0x18   :  { %1938 = vmatpush.bf16.msk.msra.mxu2 %vm1937_vm4, %v3462_v16  ;;  %vm1953_vm7 = vmpackc.low %vm161_vm0, %vm153_vm15  ;;  %vm126_vm15 = vcmp.eq.s32.totalorder %v2563_v22, %v2466_v8  ;;  %vm120_vm4 = vcmp.eq.s32.totalorder %v2560_v21, %v2470_v10  ;;  %3507 = vst [vmem:[#allocation6_spill] sm:$0xff] %v3060_v6  ;;  %v3182_v30 = vld [vmem:[%s3457_s2 + $0x118] sm:$0xff]  ;;  %v3194_v32 = vld [vmem:[%s3457_s2 + $0x1a0] sm:$0xff] }
  0x19   :  { %1954 = vmatpush.bf16.msk.msra.mxu3 %vm1953_vm7, %v3462_v16  ;;  %vm1907_vm10 = vmpackc.low %vm142_vm3, %vm134_vm2  ;;  %vm127_vm2 = vcmp.eq.s32.totalorder %v2563_v22, %v2468_v9  ;;  %vm121_vm7 = vcmp.eq.s32.totalorder %v2560_v21, %v2472_v11  ;;  %3527 = vst [vmem:[#allocation26_spill] sm:$0xff] %v3182_v30  ;;  %v3189_v31 = vld [vmem:[%s3457_s2 + $0x158] sm:$0xff]  ;;  %v3199_v33 = vld [vmem:[%s3457_s2 + $0x1e0] sm:$0xff] }
  0x1a   :  { %1908 = vmatpush.bf16.msk.msra.mxu0 %vm1907_vm10, %v3462_v16  ;;  %vm1923_vm13 = vmpackc.low %vm143_vm6, %vm135_vm5  ;;  %vm128_vm5 = vcmp.eq.s32.totalorder %v2563_v22, %v2470_v10  ;;  %vm102_vm10 = vcmp.eq.s32.totalorder %v2586_v23, %v2466_v8  ;;  %3528 = vst [vmem:[#allocation27_spill] sm:$0xff] %v3189_v31  ;;  %v3214_v35 = vld [vmem:[%s3457_s2 + $0x150] sm:$0xff]  ;;  %v3219_v36 = vld [vmem:[%s3457_s2 + $0x198] sm:$0xff] }
  0x1b   :  { %1924 = vmatpush.bf16.msk.msra.mxu1 %vm1923_vm13, %v3462_v16  ;;  %vm1939_vm0 = vmpackc.low %vm144_vm9, %vm136_vm8  ;;  %vm129_vm8 = vcmp.eq.s32.totalorder %v2563_v22, %v2472_v11  ;;  %vm103_vm13 = vcmp.eq.s32.totalorder %v2586_v23, %v2468_v9  ;;  %3529 = vst [vmem:[#allocation28_spill] sm:$0xff] %v3194_v32  ;;  %v3250_v1 = vld [vmem:[%s3457_s2 + $0x1d0] sm:$0xff] }
  0x1c   :  { %1940 = vmatpush.bf16.msk.msra.mxu2 %vm1939_vm0, %v3462_v16  ;;  %vm1955_vm3 = vmpackc.low %vm145_vm12, %vm137_vm11  ;;  %vm110_vm11 = vcmp.eq.s32.totalorder %v2589_v24, %v2466_v8  ;;  %vm104_vm0 = vcmp.eq.s32.totalorder %v2586_v23, %v2470_v10  ;;  %3530 = vst [vmem:[#allocation29_spill] sm:$0xff] %v3199_v33 }
  0x1d   :  { %1956 = vmatpush.bf16.msk.msra.mxu3 %vm1955_vm3, %v3462_v16  ;;  %vm1909_vm6 = vmpackc.low %vm126_vm15, %vm118_vm14  ;;  %vm111_vm14 = vcmp.eq.s32.totalorder %v2589_v24, %v2468_v9  ;;  %vm105_vm3 = vcmp.eq.s32.totalorder %v2586_v23, %v2472_v11  ;;  %3532 = vst [vmem:[#allocation31_spill] sm:$0xff] %v3214_v35 }
  0x1e   :  { %1910 = vmatpush.bf16.msk.msra.mxu0 %vm1909_vm6, %v3462_v16  ;;  %vm1925_vm9 = vmpackc.low %vm127_vm2, %vm119_vm1  ;;  %vm112_vm1 = vcmp.eq.s32.totalorder %v2589_v24, %v2470_v10  ;;  %vm86_vm6 = vcmp.eq.s32.totalorder %v2612_v25, %v2466_v8  ;;  %3533 = vst [vmem:[#allocation32_spill] sm:$0xff] %v3219_v36 }
  0x1f   :  { %1926 = vmatpush.bf16.msk.msra.mxu1 %vm1925_vm9, %v3462_v16  ;;  %vm1941_vm12 = vmpackc.low %vm128_vm5, %vm120_vm4  ;;  %vm113_vm4 = vcmp.eq.s32.totalorder %v2589_v24, %v2472_v11  ;;  %vm87_vm9 = vcmp.eq.s32.totalorder %v2612_v25, %v2468_v9  ;;  %3538 = vst [vmem:[#allocation37_spill] sm:$0xff] %v3250_v1 }
  0x20   :  { %1942 = vmatpush.bf16.msk.msra.mxu2 %vm1941_vm12, %v3462_v16  ;;  %vm1957_vm15 = vmpackc.low %vm129_vm8, %vm121_vm7  ;;  %vm94_vm7 = vcmp.eq.s32.totalorder %v2615_v26, %v2466_v8  ;;  %vm88_vm12 = vcmp.eq.s32.totalorder %v2612_v25, %v2470_v10 }
  0x21   :  { %1958 = vmatpush.bf16.msk.msra.mxu3 %vm1957_vm15, %v3462_v16  ;;  %vm1911_vm2 = vmpackc.low %vm110_vm11, %vm102_vm10  ;;  %vm95_vm10 = vcmp.eq.s32.totalorder %v2615_v26, %v2468_v9  ;;  %vm89_vm15 = vcmp.eq.s32.totalorder %v2612_v25, %v2472_v11 }
  0x22   :  { %1912 = vmatpush.bf16.msk.msra.mxu0 %vm1911_vm2, %v3462_v16  ;;  %vm1927_vm5 = vmpackc.low %vm111_vm14, %vm103_vm13  ;;  %vm96_vm13 = vcmp.eq.s32.totalorder %v2615_v26, %v2470_v10  ;;  %vm70_vm2 = vcmp.eq.s32.totalorder %v2464_v7, %v2466_v8 }
  0x23   :  { %1928 = vmatpush.bf16.msk.msra.mxu1 %vm1927_vm5, %v3462_v16  ;;  %vm1943_vm8 = vmpackc.low %vm112_vm1, %vm104_vm0  ;;  %vm97_vm0 = vcmp.eq.s32.totalorder %v2615_v26, %v2472_v11  ;;  %vm71_vm5 = vcmp.eq.s32.totalorder %v2464_v7, %v2468_v9 }
  0x24   :  { %1944 = vmatpush.bf16.msk.msra.mxu2 %vm1943_vm8, %v3462_v16  ;;  %vm1959_vm11 = vmpackc.low %vm113_vm4, %vm105_vm3  ;;  %vm78_vm3 = vcmp.eq.s32.totalorder %v2648_v29, %v2466_v8  ;;  %vm72_vm8 = vcmp.eq.s32.totalorder %v2464_v7, %v2470_v10  ;;  %v3066_v8 = vld [vmem:[%s3457_s2] sm:$0xff] }
  0x25   :  { %1960 = vmatpush.bf16.msk.msra.mxu3 %vm1959_vm11, %v3462_v16  ;;  %vm1913_vm14 = vmpackc.low %vm94_vm7, %vm86_vm6  ;;  %vm79_vm6 = vcmp.eq.s32.totalorder %v2648_v29, %v2468_v9  ;;  %vm73_vm11 = vcmp.eq.s32.totalorder %v2464_v7, %v2472_v11  ;;  %3508 = vst [vmem:[#allocation7_spill] sm:$0xff] %v3066_v8  ;;  %v3072_v9 = vld [vmem:[%s3457_s2 + $0x138] sm:$0xff] }
  0x26   :  { %1914 = vmatpush.bf16.msk.msra.mxu0 %vm1913_vm14, %v3462_v16  ;;  %vm1929_vm1 = vmpackc.low %vm95_vm10, %vm87_vm9  ;;  %vm80_vm9 = vcmp.eq.s32.totalorder %v2648_v29, %v2470_v10  ;;  %vm186_vm14 = vcmp.eq.s32.totalorder %v2475_v12, %v2680_v34  ;;  %3509 = vst [vmem:[#allocation8_spill] sm:$0xff] %v3072_v9  ;;  %v3077_v10 = vld [vmem:[%s3457_s2 + $0x40] sm:$0xff] }
  0x27   :  { %1930 = vmatpush.bf16.msk.msra.mxu1 %vm1929_vm1, %v3462_v16  ;;  %vm1945_vm4 = vmpackc.low %vm96_vm13, %vm88_vm12  ;;  %vm81_vm12 = vcmp.eq.s32.totalorder %v2648_v29, %v2472_v11  ;;  %vm187_vm1 = vcmp.eq.s32.totalorder %v2475_v12, %v2699_v37  ;;  %3510 = vst [vmem:[#allocation9_spill] sm:$0xff] %v3077_v10  ;;  %v3083_v11 = vld [vmem:[%s3457_s2 + $0xc8] sm:$0xff] }
  0x28   :  { %1946 = vmatpush.bf16.msk.msra.mxu2 %vm1945_vm4, %v3462_v16  ;;  %vm1961_vm7 = vmpackc.low %vm97_vm0, %vm89_vm15  ;;  %vm194_vm15 = vcmp.eq.s32.totalorder %v2478_v13, %v2680_v34  ;;  %vm188_vm4 = vcmp.eq.s32.totalorder %v2475_v12, %v2712_v38  ;;  %3511 = vst [vmem:[#allocation10_spill] sm:$0xff] %v3083_v11 }
  0x29   :  { %1962 = vmatpush.bf16.msk.msra.mxu3 %vm1961_vm7, %v3462_v16  ;;  %vm1915_vm10 = vmpackc.low %vm78_vm3, %vm70_vm2  ;;  %vm195_vm2 = vcmp.eq.s32.totalorder %v2478_v13, %v2699_v37  ;;  %vm189_vm7 = vcmp.eq.s32.totalorder %v2475_v12, %v2725_v39  ;;  %v3088_v12 = vld [vmem:[%s3457_s2 + $0x178] sm:$0xff] }
  0x2a   :  { %1916 = vmatpush.bf16.msk.msra.mxu0 %vm1915_vm10, %v3462_v16  ;;  %vm1931_vm13 = vmpackc.low %vm79_vm6, %vm71_vm5  ;;  %vm196_vm5 = vcmp.eq.s32.totalorder %v2478_v13, %v2712_v38  ;;  %vm170_vm10 = vcmp.eq.s32.totalorder %v2481_v14, %v2680_v34  ;;  %3512 = vst [vmem:[#allocation11_spill] sm:$0xff] %v3088_v12 }
  0x2b   :  { %1932 = vmatpush.bf16.msk.msra.mxu1 %vm1931_vm13, %v3462_v16  ;;  %vm1947_vm0 = vmpackc.low %vm80_vm9, %vm72_vm8  ;;  %vm197_vm8 = vcmp.eq.s32.totalorder %v2478_v13, %v2725_v39  ;;  %vm171_vm13 = vcmp.eq.s32.totalorder %v2481_v14, %v2699_v37  ;;  %v3099_v13 = vld [vmem:[%s3457_s2 + $0x130] sm:$0xff] }
  0x2c   :  { %1948 = vmatpush.bf16.msk.msra.mxu2 %vm1947_vm0, %v3462_v16  ;;  %vm1963_vm3 = vmpackc.low %vm81_vm12, %vm73_vm11  ;;  %vm178_vm11 = vcmp.eq.s32.totalorder %v2484_v15, %v2680_v34  ;;  %vm172_vm0 = vcmp.eq.s32.totalorder %v2481_v14, %v2712_v38  ;;  %3513 = vst [vmem:[#allocation12_spill] sm:$0xff] %v3099_v13 }
  0x2d   :  { %1964 = vmatpush.bf16.msk.msra.mxu3 %vm1963_vm3, %v3462_v16  ;;  %vm1965_vm6 = vmpackc.low %vm194_vm15, %vm186_vm14  ;;  %534 = vmatmul.bf16.vlgmr.msra.gmra.mxu0 %v2727_v40  ;;  %vm179_vm14 = vcmp.eq.s32.totalorder %v2484_v15, %v2699_v37  ;;  %vm173_vm3 = vcmp.eq.s32.totalorder %v2481_v14, %v2725_v39  ;;  %v3104_v14 = vld [vmem:[%s3457_s2 + $0x80] sm:$0xff] }
  0x2e   :  { %1966 = vmatpush.bf16.msk.msrb.mxu0 %vm1965_vm6, %v3462_v16  ;;  %vm1981_vm9 = vmpackc.low %vm195_vm2, %vm187_vm1  ;;  %548 = vmatmul.bf16.vlgmr.msra.gmra.mxu1 %v2727_v40  ;;  %vm180_vm1 = vcmp.eq.s32.totalorder %v2484_v15, %v2712_v38  ;;  %vm154_vm6 = vcmp.eq.s32.totalorder %v2508_v17, %v2680_v34  ;;  %3514 = vst [vmem:[#allocation13_spill] sm:$0xff] %v3104_v14 }
  0x2f   :  { %1982 = vmatpush.bf16.msk.msrb.mxu1 %vm1981_vm9, %v3462_v16  ;;  %vm1997_vm12 = vmpackc.low %vm196_vm5, %vm188_vm4  ;;  %562 = vmatmul.bf16.vlgmr.msra.gmra.mxu2 %v2727_v40  ;;  %vm181_vm4 = vcmp.eq.s32.totalorder %v2484_v15, %v2725_v39  ;;  %vm155_vm9 = vcmp.eq.s32.totalorder %v2508_v17, %v2699_v37  ;;  %v3109_v15 = vld [vmem:[%s3457_s2 + $0xc0] sm:$0xff] }
  0x30   :  { %1998 = vmatpush.bf16.msk.msrb.mxu2 %vm1997_vm12, %v3462_v16  ;;  %vm2013_vm15 = vmpackc.low %vm197_vm8, %vm189_vm7  ;;  %576 = vmatmul.bf16.vlgmr.msra.gmra.mxu3 %v2727_v40  ;;  %vm162_vm7 = vcmp.eq.s32.totalorder %v2511_v18, %v2680_v34  ;;  %vm156_vm12 = vcmp.eq.s32.totalorder %v2508_v17, %v2712_v38  ;;  %3515 = vst [vmem:[#allocation14_spill] sm:$0xff] %v3109_v15 }
  0x31   :  { %2014 = vmatpush.bf16.msk.msrb.mxu3 %vm2013_vm15, %v3462_v16  ;;  %vm1967_vm2 = vmpackc.low %vm178_vm11, %vm170_vm10  ;;  %vm163_vm10 = vcmp.eq.s32.totalorder %v2511_v18, %v2699_v37  ;;  %vm157_vm15 = vcmp.eq.s32.totalorder %v2508_v17, %v2725_v39  ;;  %v3115_v17 = vld [vmem:[%s3457_s2 + $0x170] sm:$0xff] }
  0x32   :  { %1968 = vmatpush.bf16.msk.msrb.mxu0 %vm1967_vm2, %v3462_v16  ;;  %vm1983_vm5 = vmpackc.low %vm179_vm14, %vm171_vm13  ;;  %vm164_vm13 = vcmp.eq.s32.totalorder %v2511_v18, %v2712_v38  ;;  %vm138_vm2 = vcmp.eq.s32.totalorder %v2534_v19, %v2680_v34  ;;  %3516 = vst [vmem:[#allocation15_spill] sm:$0xff] %v3115_v17 }
  0x33   :  { %1984 = vmatpush.bf16.msk.msrb.mxu1 %vm1983_vm5, %v3462_v16  ;;  %vm1999_vm8 = vmpackc.low %vm180_vm1, %vm172_vm0  ;;  %vm165_vm0 = vcmp.eq.s32.totalorder %v2511_v18, %v2725_v39  ;;  %vm139_vm5 = vcmp.eq.s32.totalorder %v2534_v19, %v2699_v37  ;;  %v3120_v18 = vld [vmem:[%s3457_s2 + $0x1b8] sm:$0xff] }
  0x34   :  { %2000 = vmatpush.bf16.msk.msrb.mxu2 %vm1999_vm8, %v3462_v16  ;;  %vm2015_vm11 = vmpackc.low %vm181_vm4, %vm173_vm3  ;;  %vm146_vm3 = vcmp.eq.s32.totalorder %v2537_v20, %v2680_v34  ;;  %vm140_vm8 = vcmp.eq.s32.totalorder %v2534_v19, %v2712_v38  ;;  %3517 = vst [vmem:[#allocation16_spill] sm:$0xff] %v3120_v18 }
  0x35   :  { %2016 = vmatpush.bf16.msk.msrb.mxu3 %vm2015_vm11, %v3462_v16  ;;  %vm1969_vm14 = vmpackc.low %vm162_vm7, %vm154_vm6  ;;  %vm147_vm6 = vcmp.eq.s32.totalorder %v2537_v20, %v2699_v37  ;;  %vm141_vm11 = vcmp.eq.s32.totalorder %v2534_v19, %v2725_v39  ;;  %v3125_v19 = vld [vmem:[%s3457_s2 + $0x1f8] sm:$0xff] }
  0x36   :  { %1970 = vmatpush.bf16.msk.msrb.mxu0 %vm1969_vm14, %v3462_v16  ;;  %vm1985_vm1 = vmpackc.low %vm163_vm10, %vm155_vm9  ;;  %vm148_vm9 = vcmp.eq.s32.totalorder %v2537_v20, %v2712_v38  ;;  %vm122_vm14 = vcmp.eq.s32.totalorder %v2560_v21, %v2680_v34  ;;  %3518 = vst [vmem:[#allocation17_spill] sm:$0xff] %v3125_v19 }
  0x37   :  { %1986 = vmatpush.bf16.msk.msrb.mxu1 %vm1985_vm1, %v3462_v16  ;;  %vm2001_vm4 = vmpackc.low %vm164_vm13, %vm156_vm12  ;;  %vm149_vm12 = vcmp.eq.s32.totalorder %v2537_v20, %v2725_v39  ;;  %vm123_vm1 = vcmp.eq.s32.totalorder %v2560_v21, %v2699_v37  ;;  %v3132_v20 = vld [vmem:[%s3457_s2 + $0x128] sm:$0xff] }
  0x38   :  { %2002 = vmatpush.bf16.msk.msrb.mxu2 %vm2001_vm4, %v3462_v16  ;;  %vm2017_vm7 = vmpackc.low %vm165_vm0, %vm157_vm15  ;;  %vm130_vm15 = vcmp.eq.s32.totalorder %v2563_v22, %v2680_v34  ;;  %vm124_vm4 = vcmp.eq.s32.totalorder %v2560_v21, %v2712_v38  ;;  %3519 = vst [vmem:[#allocation18_spill] sm:$0xff] %v3132_v20 }
  0x39   :  { %2018 = vmatpush.bf16.msk.msrb.mxu3 %vm2017_vm7, %v3462_v16  ;;  %vm1971_vm10 = vmpackc.low %vm146_vm3, %vm138_vm2  ;;  %vm131_vm2 = vcmp.eq.s32.totalorder %v2563_v22, %v2699_v37  ;;  %vm125_vm7 = vcmp.eq.s32.totalorder %v2560_v21, %v2725_v39  ;;  %v3141_v21 = vld [vmem:[%s3457_s2 + $0x168] sm:$0xff] }
  0x3a   :  { %1972 = vmatpush.bf16.msk.msrb.mxu0 %vm1971_vm10, %v3462_v16  ;;  %vm1987_vm13 = vmpackc.low %vm147_vm6, %vm139_vm5  ;;  %vm132_vm5 = vcmp.eq.s32.totalorder %v2563_v22, %v2712_v38  ;;  %vm106_vm10 = vcmp.eq.s32.totalorder %v2586_v23, %v2680_v34  ;;  %3520 = vst [vmem:[#allocation19_spill] sm:$0xff] %v3141_v21 }
  0x3b   :  { %1988 = vmatpush.bf16.msk.msrb.mxu1 %vm1987_vm13, %v3462_v16  ;;  %vm2003_vm0 = vmpackc.low %vm148_vm9, %vm140_vm8  ;;  %vm133_vm8 = vcmp.eq.s32.totalorder %v2563_v22, %v2725_v39  ;;  %vm107_vm13 = vcmp.eq.s32.totalorder %v2586_v23, %v2699_v37  ;;  %v3146_v22 = vld [vmem:[%s3457_s2 + $0x1b0] sm:$0xff] }
  0x3c   :  { %2004 = vmatpush.bf16.msk.msrb.mxu2 %vm2003_vm0, %v3462_v16  ;;  %vm2019_vm3 = vmpackc.low %vm149_vm12, %vm141_vm11  ;;  %vm114_vm11 = vcmp.eq.s32.totalorder %v2589_v24, %v2680_v34  ;;  %vm108_vm0 = vcmp.eq.s32.totalorder %v2586_v23, %v2712_v38  ;;  %3521 = vst [vmem:[#allocation20_spill] sm:$0xff] %v3146_v22 }
  0x3d   :  { %2020 = vmatpush.bf16.msk.msrb.mxu3 %vm2019_vm3, %v3462_v16  ;;  %vm1973_vm6 = vmpackc.low %vm130_vm15, %vm122_vm14  ;;  %vm115_vm14 = vcmp.eq.s32.totalorder %v2589_v24, %v2699_v37  ;;  %vm109_vm3 = vcmp.eq.s32.totalorder %v2586_v23, %v2725_v39  ;;  %v3151_v23 = vld [vmem:[%s3457_s2 + $0x1f0] sm:$0xff] }
  0x3e   :  { %1974 = vmatpush.bf16.msk.msrb.mxu0 %vm1973_vm6, %v3462_v16  ;;  %vm1989_vm9 = vmpackc.low %vm131_vm2, %vm123_vm1  ;;  %vm116_vm1 = vcmp.eq.s32.totalorder %v2589_v24, %v2712_v38  ;;  %vm90_vm6 = vcmp.eq.s32.totalorder %v2612_v25, %v2680_v34  ;;  %3522 = vst [vmem:[#allocation21_spill] sm:$0xff] %v3151_v23 }
  0x3f   :  { %1990 = vmatpush.bf16.msk.msrb.mxu1 %vm1989_vm9, %v3462_v16  ;;  %vm2005_vm12 = vmpackc.low %vm132_vm5, %vm124_vm4  ;;  %vm117_vm4 = vcmp.eq.s32.totalorder %v2589_v24, %v2725_v39  ;;  %vm91_vm9 = vcmp.eq.s32.totalorder %v2612_v25, %v2699_v37  ;;  %v3158_v24 = vld [vmem:[%s3457_s2 + $0x120] sm:$0xff] }
  0x40   :  { %2006 = vmatpush.bf16.msk.msrb.mxu2 %vm2005_vm12, %v3462_v16  ;;  %vm2021_vm15 = vmpackc.low %vm133_vm8, %vm125_vm7  ;;  %vm98_vm7 = vcmp.eq.s32.totalorder %v2615_v26, %v2680_v34  ;;  %vm92_vm12 = vcmp.eq.s32.totalorder %v2612_v25, %v2712_v38  ;;  %3523 = vst [vmem:[#allocation22_spill] sm:$0xff] %v3158_v24 }
  0x41   :  { %2022 = vmatpush.bf16.msk.msrb.mxu3 %vm2021_vm15, %v3462_v16  ;;  %vm1975_vm2 = vmpackc.low %vm114_vm11, %vm106_vm10  ;;  %vm99_vm10 = vcmp.eq.s32.totalorder %v2615_v26, %v2699_v37  ;;  %vm93_vm15 = vcmp.eq.s32.totalorder %v2612_v25, %v2725_v39  ;;  %v3165_v25 = vld [vmem:[%s3457_s2 + $0x160] sm:$0xff] }
  0x42   :  { %1976 = vmatpush.bf16.msk.msrb.mxu0 %vm1975_vm2, %v3462_v16  ;;  %vm1991_vm5 = vmpackc.low %vm115_vm14, %vm107_vm13  ;;  %vm100_vm13 = vcmp.eq.s32.totalorder %v2615_v26, %v2712_v38  ;;  %vm74_vm2 = vcmp.eq.s32.totalorder %v2464_v7, %v2680_v34  ;;  %3524 = vst [vmem:[#allocation23_spill] sm:$0xff] %v3165_v25 }
  0x43   :  { %1992 = vmatpush.bf16.msk.msrb.mxu1 %vm1991_vm5, %v3462_v16  ;;  %vm2007_vm8 = vmpackc.low %vm116_vm1, %vm108_vm0  ;;  %vm101_vm0 = vcmp.eq.s32.totalorder %v2615_v26, %v2725_v39  ;;  %vm75_vm5 = vcmp.eq.s32.totalorder %v2464_v7, %v2699_v37  ;;  %v3170_v26 = vld [vmem:[%s3457_s2 + $0x1a8] sm:$0xff] }
  0x44   :  { %2008 = vmatpush.bf16.msk.msrb.mxu2 %vm2007_vm8, %v3462_v16  ;;  %vm2023_vm11 = vmpackc.low %vm117_vm4, %vm109_vm3  ;;  %vm82_vm3 = vcmp.eq.s32.totalorder %v2648_v29, %v2680_v34  ;;  %vm76_vm8 = vcmp.eq.s32.totalorder %v2464_v7, %v2712_v38  ;;  %3525 = vst [vmem:[#allocation24_spill] sm:$0xff] %v3170_v26  ;;  %v3207_v34 = vld [vmem:[%s3457_s2 + $0x110] sm:$0xff] }
  0x45   :  { %2024 = vmatpush.bf16.msk.msrb.mxu3 %vm2023_vm11, %v3462_v16  ;;  %vm1977_vm14 = vmpackc.low %vm98_vm7, %vm90_vm6  ;;  %vm83_vm6 = vcmp.eq.s32.totalorder %v2648_v29, %v2699_v37  ;;  %vm77_vm11 = vcmp.eq.s32.totalorder %v2464_v7, %v2725_v39  ;;  %3531 = vst [vmem:[#allocation30_spill] sm:$0xff] %v3207_v34  ;;  %v3224_v37 = vld [vmem:[%s3457_s2 + $0x1d8] sm:$0xff] }
  0x46   :  { %1978 = vmatpush.bf16.msk.msrb.mxu0 %vm1977_vm14, %v3462_v16  ;;  %vm1993_vm1 = vmpackc.low %vm99_vm10, %vm91_vm9  ;;  %vm84_vm9 = vcmp.eq.s32.totalorder %v2648_v29, %v2712_v38  ;;  %3534 = vst [vmem:[#allocation33_spill] sm:$0xff] %v3224_v37  ;;  %v3465_v38 = vmov 0.0  }
  0x47   :  { %1994 = vmatpush.bf16.msk.msrb.mxu1 %vm1993_vm1, %v3462_v16  ;;  %vm2009_vm4 = vmpackc.low %vm100_vm13, %vm92_vm12  ;;  %vm85_vm12 = vcmp.eq.s32.totalorder %v2648_v29, %v2725_v39  ;;  %v3175_v29 = vld [vmem:[%s3457_s2 + $0x1e8] sm:$0xff]  ;;  %vm766_vm1 = vcmp.eq.s32.totalorder %v2452_v0, 2 }
  0x48   :  { %2010 = vmatpush.bf16.msk.msrb.mxu2 %vm2009_vm4, %v3462_v16  ;;  %vm2025_vm7 = vmpackc.low %vm101_vm0, %vm93_vm15  ;;  %3526 = vst [vmem:[#allocation25_spill] sm:$0xff] %v3175_v29  ;;  %vm686_vm0 = vcmp.eq.s32.totalorder %v2452_v0, 1  ;;  %vm767_vm4 = vcmp.eq.s32.totalorder %v2457_v2, 2 }
  0x49   :  { %2026 = vmatpush.bf16.msk.msrb.mxu3 %vm2025_vm7, %v3462_v16  ;;  %vm1979_vm10 = vmpackc.low %vm82_vm3, %vm74_vm2  ;;  %v2033_v39 = vsel %vm686_vm0, 1.0, %v3465_v38  ;;  %vm638_vm2 = vcmp.eq.s32.totalorder %v2452_v0, 0  ;;  %v3245_v0 = vld [vmem:[%s3457_s2 + $0x190] sm:$0xff]  ;;  %vm687_vm3 = vcmp.eq.s32.totalorder %v2457_v2, 1  ;;  %vm688_vm7 = vcmp.eq.s32.totalorder %v2625_v27, 1 }
  0x4a   :  { %1980 = vmatpush.bf16.msk.msrb.mxu0 %vm1979_vm10, %v3462_v16  ;;  %vm1995_vm13 = vmpackc.low %vm83_vm6, %vm75_vm5  ;;  %3537 = vst [vmem:[#allocation36_spill] sm:$0xff] %v3245_v0  ;;  %v702_v38 = vperm.slane %v2033_v39, 1  ;;  %vm639_vm5 = vcmp.eq.s32.totalorder %v2457_v2, 0  ;;  %vm838_vm6 = vcmask 1041408   ;;  %vm689_vm10 = vcmp.eq.s32.totalorder %v2640_v28, 1 }
  0x4b   :  { %1996 = vmatpush.bf16.msk.msrb.mxu1 %vm1995_vm13, %v3462_v16  ;;  %vm2011_vm14 = vmpackc.low %vm84_vm9, %vm76_vm8  ;;  %vm640_vm8 = vcmp.eq.s32.totalorder %v2625_v27, 0  ;;  %vm768_vm9 = vcmp.eq.s32.totalorder %v2625_v27, 2  ;;  %vm902_vm13 = vcmask 1040384  }
  0x4c   :  { %2012 = vmatpush.bf16.msk.msrb.mxu2 %vm2011_vm14, %v3462_v16  ;;  %vm2027_vm15 = vmpackc.low %vm85_vm12, %vm77_vm11  ;;  %vm769_vm11 = vcmp.eq.s32.totalorder %v2640_v28, 2  ;;  %vm641_vm12 = vcmp.eq.s32.totalorder %v2640_v28, 0  ;;  %vm904_vm14 = vcmask 1042434  }
  0x4d   :  { %2028 = vmatpush.bf16.msk.msrb.mxu3 %vm2027_vm15, %v3462_v16  ;;  %590 = vmatmul.bf16.vlgmr.msrb.gmra.mxu0 %v2727_v40  ;;  %v3240_v16 = vld [vmem:[%s3457_s2 + $0x148] sm:$0xff] }
  0x4e   :  { %1497 = vmatpush.bf16.msra.mxu0 %v2889_v41  ;;  %604 = vmatmul.bf16.vlgmr.msrb.gmra.mxu1 %v2727_v40  ;;  %3536 = vst [vmem:[#allocation35_spill] sm:$0xff] %v3240_v16 }
  0x4f   :  { %1510 = vmatpush.bf16.msra.mxu1 %v2899_v42  ;;  %618 = vmatmul.bf16.vlgmr.msrb.gmra.mxu2 %v2727_v40 }
  0x50   :  { %1523 = vmatpush.bf16.msra.mxu2 %v2910_v43  ;;  %632 = vmatmul.bf16.vlgmr.msrb.gmra.mxu3 %v2727_v40  ;;  %v3234_v40 = vld [vmem:[%s3457_s2 + $0x108] sm:$0xff] }
  0x51   :  { %1536 = vmatpush.bf16.msra.mxu3 %v2931_v46  ;;  %3535 = vst [vmem:[#allocation34_spill] sm:$0xff] %v3234_v40 }
  0x52   :  { %1498 = vmatpush.bf16.msra.mxu0 %v2917_v44 }
  0x53   :  { %1511 = vmatpush.bf16.msra.mxu1 %v2924_v45 }
  0x54   :  { %1524 = vmatpush.bf16.msra.mxu2 %v2938_v47 }
  0x55   :  { %1537 = vmatpush.bf16.msra.mxu3 %v2958_v50 }
  0x56   :  { %1499 = vmatpush.bf16.msra.mxu0 %v2945_v48 }
  0x57   :  { %1512 = vmatpush.bf16.msra.mxu1 %v2952_v49 }
  0x58   :  { %1525 = vmatpush.bf16.msra.mxu2 %v2964_v51 }
  0x59   :  { %1538 = vmatpush.bf16.msra.mxu3 %v2982_v54 }
  0x5a   :  { %1500 = vmatpush.bf16.msra.mxu0 %v2970_v52 }
  0x5b   :  { %1513 = vmatpush.bf16.msra.mxu1 %v2976_v53 }
  0x5c   :  { %1526 = vmatpush.bf16.msra.mxu2 %v2988_v55 }
  0x5d   :  { %1539 = vmatpush.bf16.msra.mxu3 %v3006_v58 }
  0x5e   :  { %1501 = vmatpush.bf16.msra.mxu0 %v2994_v56 }
  0x5f   :  { %1514 = vmatpush.bf16.msra.mxu1 %v3000_v57 }
  0x60   :  { %1527 = vmatpush.bf16.msra.mxu2 %v3012_v59 }
  0x61   :  { %1540 = vmatpush.bf16.msra.mxu3 %v3030_v62 }
  0x62   :  { %1502 = vmatpush.bf16.msra.mxu0 %v3018_v60 }
  0x63   :  { %1515 = vmatpush.bf16.msra.mxu1 %v3024_v61 }
  0x64   :  { %1528 = vmatpush.bf16.msra.mxu2 %v3036_v63 }
  0x65   :  { %1541 = vmatpush.bf16.msra.mxu3 %v3054_v5 }
  0x66   :  { %1503 = vmatpush.bf16.msra.mxu0 %v3042_v3 }
  0x67   :  { %1516 = vmatpush.bf16.msra.mxu1 %v3048_v4 }
  0x68   :  { %1529 = vmatpush.bf16.msra.mxu2 %v3060_v6 }
  0x69   :  { %1542 = vmatpush.bf16.msra.mxu3 %v3083_v11 }
  0x6a   :  { %1504 = vmatpush.bf16.msra.mxu0 %v3066_v8 }
  0x6b   :  { %1517 = vmatpush.bf16.msra.mxu1 %v3077_v10 }
  0x6c   :  { %1530 = vmatpush.bf16.msra.mxu2 %v3104_v14 }
  0x6d   :  { %1543 = vmatpush.bf16.msra.mxu3 %v3109_v15 }
  0x6e   :  { %1549 = vmatpush.bf16.msrb.mxu0 %v3072_v9 }
  0x6f   :  { %1562 = vmatpush.bf16.msrb.mxu1 %v3088_v12 }
  0x70   :  { %1575 = vmatpush.bf16.msrb.mxu2 %v3120_v18 }
  0x71   :  { %1588 = vmatpush.bf16.msrb.mxu3 %v3125_v19 }
  0x72   :  { %1550 = vmatpush.bf16.msrb.mxu0 %v3099_v13 }
  0x73   :  { %1563 = vmatpush.bf16.msrb.mxu1 %v3115_v17 }
  0x74   :  { %1576 = vmatpush.bf16.msrb.mxu2 %v3146_v22 }
  0x75   :  { %1589 = vmatpush.bf16.msrb.mxu3 %v3151_v23 }
  0x76   :  { %1551 = vmatpush.bf16.msrb.mxu0 %v3132_v20 }
  0x77   :  { %1564 = vmatpush.bf16.msrb.mxu1 %v3141_v21 }
  0x78   :  { %1577 = vmatpush.bf16.msrb.mxu2 %v3170_v26 }
  0x79   :  { %1590 = vmatpush.bf16.msrb.mxu3 %v3175_v29 }
  0x7a   :  { %1552 = vmatpush.bf16.msrb.mxu0 %v3158_v24 }
  0x7b   :  { %1565 = vmatpush.bf16.msrb.mxu1 %v3165_v25 }
  0x7c   :  { %1578 = vmatpush.bf16.msrb.mxu2 %v3194_v32  ;;  %v3265_v32 = vld [vmem:[%s3457_s2 + $0x140] sm:$0xff] }
  0x7d   :  { %1591 = vmatpush.bf16.msrb.mxu3 %v3199_v33  ;;  %v703_v33 = vperm.slane %v2033_v39, 5  ;;  %3541 = vst [vmem:[#allocation39_spill] sm:$0xff] %v3265_v32  ;;  %v3276_v39 = vld [vmem:[%s3457_s2 + $0x1c8] sm:$0xff] }
  0x7e   :  { %1553 = vmatpush.bf16.msrb.mxu0 %v3182_v30  ;;  %3543 = vst [vmem:[#allocation41_spill] sm:$0xff] %v3276_v39 }
  0x7f   :  { %1566 = vmatpush.bf16.msrb.mxu1 %v3189_v31  ;;  %v719_v26 = vperm.slane %v703_v33, 1  ;;  %v3289_v33 = vld [vmem:[%s3457_s2 + $0x180] sm:$0xff] }
  0x80   :  { %1579 = vmatpush.bf16.msrb.mxu2 %v3219_v36  ;;  %v3539_v36 = vmov 0.0   ;;  %3544 = vst [vmem:[#allocation42_spill] sm:$0xff] %v3289_v33 }
  0x81   :  { %1592 = vmatpush.bf16.msrb.mxu3 %v3224_v37  ;;  %v3257_v37 = vld [vmem:[%s3457_s2 + $0x100] sm:$0xff]  ;;  %v2034_v24 = vsel %vm687_vm3, 1.0, %v3539_v36  ;;  %v2030_v2 = vsel %vm639_vm5, 1.0, %v3539_v36 }
  0x82   :  { %1554 = vmatpush.bf16.msrb.mxu0 %v3207_v34  ;;  %3540 = vst [vmem:[#allocation38_spill] sm:$0xff] %v3257_v37  ;;  %v2029_v34 = vsel %vm638_vm2, 1.0, %v3539_v36  ;;  %v657_v13 = vperm.slane %v2030_v2, 5 }
  0x83   :  { %1567 = vmatpush.bf16.msrb.mxu1 %v3214_v35  ;;  %v2037_v35 = vsel %vm766_vm1, 1.0, %v3539_v36  ;;  %v655_v29 = vperm.slane %v2029_v34, 5 }
  0x84   :  { %1580 = vmatpush.bf16.msrb.mxu2 %v3245_v0  ;;  %v782_v31 = vperm.slane %v2037_v35, 1  ;;  %v718_v0 = vperm.slane %v702_v38, 1  ;;  %v783_v30 = vperm.slane %v2037_v35, 5 }
  0x85   :  { %1593 = vmatpush.bf16.msrb.mxu3 %v3250_v1 }
  0x86   :  { %1555 = vmatpush.bf16.msrb.mxu0 %v3234_v40  ;;  %v3270_v40 = vld [vmem:[%s3457_s2 + $0x188] sm:$0xff]  ;;  %v798_v23 = vperm.slane %v782_v31, 1  ;;  %v799_v35 = vperm.slane %v783_v30, 1  ;;  %v671_v31 = vperm.slane %v655_v29, 1  ;;  %v656_v29 = vperm.slane %v2030_v2, 1 }
  0x87   :  { %1568 = vmatpush.bf16.msrb.mxu1 %v3240_v16  ;;  %3542 = vst [vmem:[#allocation40_spill] sm:$0xff] %v3270_v40  ;;  %v654_v16 = vperm.slane %v2029_v34, 1  ;;  %v3294_v34 = vld [vmem:[%s3457_s2 + $0x1c0] sm:$0xff]  ;;  %s3343_s2 = sld [smem:[#allocation2]] }
  0x88   :  { %1581 = vmatpush.bf16.msrb.mxu2 %v3270_v40  ;;  %3545 = vst [vmem:[#allocation43_spill] sm:$0xff] %v3294_v34 }
  0x89   :  { %1594 = vmatpush.bf16.msrb.mxu3 %v3276_v39  ;;  %v670_v38 = vperm.slane %v654_v16, 1  ;;  %v2038_v39 = vsel %vm767_vm4, 1.0, %v3539_v36  ;;  %v705_v16 = vperm.slane %v2034_v24, 5 }
  0x8a   :  { %1556 = vmatpush.bf16.msrb.mxu0 %v3257_v37  ;;  %v784_v18 = vperm.slane %v2038_v39, 1  ;;  %v785_v15 = vperm.slane %v2038_v39, 5 }
  0x8b   :  { %1569 = vmatpush.bf16.msrb.mxu1 %v3265_v32  ;;  %v704_v32 = vperm.slane %v2034_v24, 1 }
  0x8c   :  { %1582 = vmatpush.bf16.msrb.mxu2 %v3289_v33  ;;  %v721_v33 = vperm.slane %v705_v16, 1  ;;  %v801_v10 = vperm.slane %v785_v15, 1 }
  0x8d   :  { %1595 = vmatpush.bf16.msrb.mxu3 %v3294_v34 }
  0xaa   :  { %v535_v25 = vpop.f32.mrf.mxu0 }
  0xab   :  { %v549_v1 = vpop.f32.mrf.mxu1  ;;  %v726_v22 = vmul.f32 %v718_v0, %v535_v25  ;;  %v806_v30 = vmul.f32 %v798_v23, %v535_v25  ;;  %v678_v0 = vmul.f32 %v670_v38, %v535_v25 }
  0xac   :  { %v727_v40 = vmul.f32 %v719_v26, %v549_v1  ;;  %v807_v21 = vmul.f32 %v799_v35, %v549_v1  ;;  %v679_v20 = vmul.f32 %v671_v31, %v549_v1  ;;  %v720_v26 = vperm.slane %v704_v32, 1 }
  0xad   :  { %v742_v37 = vrot.slane %v726_v22, 3  ;;  %v839_v11 = vrot.slane %v806_v30, 6  ;;  %v800_v1 = vperm.slane %v784_v18, 1  ;;  %v673_v32 = vperm.slane %v657_v13, 1 }
  0xae   :  { %v743_v19 = vrot.slane %v727_v40, 3  ;;  %v842_v25 = vrot.slane %v807_v21, 6  ;;  %v672_v40 = vperm.slane %v656_v29, 1 }
  0xaf   :  { %v758_v6 = vadd.f32 %v742_v37, %v678_v0 }
  0xb0   :  { %v759_v22 = vadd.f32 %v743_v19, %v679_v20 }
  0xb2   :  { %v563_v17 = vpop.f32.mrf.mxu2  ;;  %v537_v7 = vpop.f32.mrf.mxu0 }
  0xb3   :  { %v577_v14 = vpop.f32.mrf.mxu3  ;;  %v814_v12 = vmul.f32 %v798_v23, %v537_v7  ;;  %v551_v24 = vpop.f32.mrf.mxu1  ;;  %v728_v31 = vmul.f32 %v720_v26, %v563_v17  ;;  %v808_v37 = vmul.f32 %v800_v1, %v563_v17 }
  0xb4   :  { %v815_v34 = vmul.f32 %v799_v35, %v551_v24  ;;  %v729_v8 = vmul.f32 %v721_v33, %v577_v14  ;;  %v680_v35 = vmul.f32 %v672_v40, %v563_v17  ;;  %v809_v19 = vmul.f32 %v801_v10, %v577_v14 }
  0xb5   :  { %v840_v38 = vrot.slane %v814_v12, 6  ;;  %v744_v21 = vrot.slane %v728_v31, 3  ;;  %v681_v20 = vmul.f32 %v673_v32, %v577_v14  ;;  %v845_v16 = vrot.slane %v808_v37, 6 }
  0xb6   :  { %v843_v9 = vrot.slane %v815_v34, 6  ;;  %v745_v15 = vrot.slane %v729_v8, 3  ;;  %v848_v26 = vrot.slane %v809_v19, 6  ;;  %v2035_v32 = vsel %vm688_vm7, 1.0, %v3539_v36 }
  0xb7   :  { %v841_v39 = vsel %vm838_vm6, %v839_v11, %v840_v38  ;;  %v760_v29 = vadd.f32 %v744_v21, %v680_v35  ;;  %v2031_v37 = vsel %vm640_vm8, 1.0, %v3539_v36  ;;  %v706_v35 = vperm.slane %v2035_v32, 1 }
  0xb8   :  { %v3301_v2 = vadd.f32 %v841_v39, %v758_v6  ;;  %v844_v7 = vsel %vm838_vm6, %v842_v25, %v843_v9  ;;  %v761_v14 = vadd.f32 %v745_v15, %v681_v20  ;;  %v658_v15 = vperm.slane %v2031_v37, 1 }
  0xb9   :  { %v3304_v23 = vadd.f32 %v844_v7, %v759_v22 }
  0xba   :  { %v1041_v12 = vpack.c.bf16 %v3301_v2, %v3301_v2  ;;  %v565_v18 = vpop.f32.mrf.mxu2 }
  0xbb   :  { %v1042_v13 = vpack.c.bf16 %v3304_v23, %v3304_v23  ;;  %v816_v11 = vmul.f32 %v800_v1, %v565_v18  ;;  %v579_v6 = vpop.f32.mrf.mxu3  ;;  %v707_v18 = vperm.slane %v2035_v32, 5 }
  0xbc   :  { %v817_v33 = vmul.f32 %v801_v10, %v579_v6  ;;  %v1050_v34 = vshrl.u32 %v1041_v12, 16  ;;  %v1052_v9 = vshll.u32 %v1041_v12, 16  ;;  %v2039_v12 = vsel %vm768_vm9, 1.0, %v3539_v36 }
  0xbd   :  { %v846_v17 = vrot.slane %v816_v11, 6  ;;  %v1057_v30 = vshrl.u32 %v1042_v13, 16  ;;  %v1059_v0 = vshll.u32 %v1042_v13, 16  ;;  %v786_v6 = vperm.slane %v2039_v12, 1 }
  0xbe   :  { %v849_v24 = vrot.slane %v817_v33, 6  ;;  %v1054_v25 = vrot.slane %v1052_v9, 1  ;;  %v722_v33 = vperm.slane %v706_v35, 1  ;;  %v723_v9 = vperm.slane %v707_v18, 1 }
  0xbf   :  { %v847_v8 = vsel %vm838_vm6, %v845_v16, %v846_v17  ;;  %v1061_v22 = vrot.slane %v1059_v0, 1  ;;  %v802_v0 = vperm.slane %v786_v6, 1 }
  0xc0   :  { %v3312_v38 = vadd.f32 %v847_v8, %v760_v29  ;;  %v850_v10 = vsel %vm838_vm6, %v848_v26, %v849_v24  ;;  %v1055_v1 = vor.u32 %v1054_v25, %v1050_v34  ;;  %v659_v34 = vperm.slane %v2031_v37, 5 }
  0xc1   :  { %v3316_v40 = vadd.f32 %v850_v10, %v761_v14  ;;  %v1062_v31 = vor.u32 %v1061_v22, %v1057_v30  ;;  %v674_v29 = vperm.slane %v658_v15, 1  ;;  %v2040_v14 = vsel %vm769_vm11, 1.0, %v3539_v36 }
  0xc2   :  { %v1043_v39 = vpack.c.bf16 %v3312_v38, %v3312_v38  ;;  %1505 = vmatmul.bf16.vlgmr.msra.gmra.mxu0 %v1055_v1  ;;  %v675_v24 = vperm.slane %v659_v34, 1  ;;  %v788_v1 = vperm.slane %v2040_v14, 1 }
  0xc3   :  { %v1044_v7 = vpack.c.bf16 %v3316_v40, %v3316_v40  ;;  %1518 = vmatmul.bf16.vlgmr.msra.gmra.mxu1 %v1062_v31  ;;  %1651 = vmatpush.bf16.msra.mxu0 %v2889_v41 }
  0xc4   :  { %1664 = vmatpush.bf16.msra.mxu1 %v2899_v42  ;;  %v1066_v21 = vshll.u32 %v1043_v39, 16  ;;  %v1064_v19 = vshrl.u32 %v1043_v39, 16  ;;  %v787_v42 = vperm.slane %v2039_v12, 5 }
  0xc5   :  { %v1073_v27 = vshll.u32 %v1044_v7, 16  ;;  %v1071_v13 = vshrl.u32 %v1044_v7, 16  ;;  %v789_v7 = vperm.slane %v2040_v14, 5 }
  0xc6   :  { %v1068_v20 = vrot.slane %v1066_v21, 1 }
  0xc7   :  { %1652 = vmatpush.bf16.msra.mxu0 %v2917_v44  ;;  %v1075_v11 = vrot.slane %v1073_v27, 1  ;;  %v2036_v44 = vsel %vm689_vm10, 1.0, %v3539_v36 }
  0xc8   :  { %v1069_v41 = vor.u32 %v1068_v20, %v1064_v19  ;;  %1665 = vmatpush.bf16.msra.mxu1 %v2924_v45  ;;  %v803_v45 = vperm.slane %v787_v42, 1  ;;  %v708_v8 = vperm.slane %v2036_v44, 1  ;;  %v709_v22 = vperm.slane %v2036_v44, 5 }
  0xc9   :  { %v1076_v16 = vor.u32 %v1075_v11, %v1071_v13 }
  0xca   :  { %v591_v17 = vpop.f32.mrf.mxu0  ;;  %1531 = vmatmul.bf16.vlgmr.msra.gmra.mxu2 %v1069_v41  ;;  %v725_v21 = vperm.slane %v709_v22, 1 }
  0xcb   :  { %v605_v30 = vpop.f32.mrf.mxu1  ;;  %1544 = vmatmul.bf16.vlgmr.msra.gmra.mxu3 %v1076_v16  ;;  %1677 = vmatpush.bf16.msra.mxu2 %v2910_v43  ;;  %v730_v26 = vmul.f32 %v722_v33, %v591_v17  ;;  %v2032_v43 = vsel %vm641_vm12, 1.0, %v3539_v36  ;;  %v810_v10 = vmul.f32 %v802_v0, %v591_v17  ;;  %v805_v33 = vperm.slane %v789_v7, 1 }
  0xcc   :  { %1690 = vmatpush.bf16.msra.mxu3 %v2931_v46  ;;  %1653 = vmatpush.bf16.msra.mxu0 %v2945_v48  ;;  %v731_v25 = vmul.f32 %v723_v9, %v605_v30  ;;  %v682_v46 = vmul.f32 %v674_v29, %v591_v17  ;;  %v811_v28 = vmul.f32 %v803_v45, %v605_v30  ;;  %v660_v32 = vperm.slane %v2032_v43, 1 }
  0xcd   :  { %1666 = vmatpush.bf16.msra.mxu1 %v2952_v49  ;;  %v746_v48 = vrot.slane %v730_v26, 3  ;;  %v683_v49 = vmul.f32 %v675_v24, %v605_v30  ;;  %v661_v35 = vperm.slane %v2032_v43, 5  ;;  %v880_v9 = vstv %s3343_s2 }
  0xce   :  { %v747_v31 = vrot.slane %v731_v25, 3  ;;  %v854_v19 = vrot.slane %v811_v28, 6  ;;  %v676_v13 = vperm.slane %v660_v32, 1  ;;  %v3546_v32 = vld [vmem:[#allocation7_spill] sm:$0xff] }
  0xcf   :  { %1678 = vmatpush.bf16.msra.mxu2 %v2938_v47  ;;  %v724_v47 = vperm.slane %v708_v8, 1  ;;  %v677_v41 = vperm.slane %v661_v35, 1  ;;  %v883_v35 = vmul.f32 %v880_v9, %v3312_v38  ;;  %v2390_v38 = vld [vmem:[%s3455_s0] sm:$0x77] }
  0xd0   :  { %1691 = vmatpush.bf16.msra.mxu3 %v2958_v50  ;;  %1654 = vmatpush.bf16.msra.mxu0 %v2970_v52  ;;  %v851_v50 = vrot.slane %v810_v10, 6  ;;  %v762_v52 = vadd.f32 %v746_v48, %v682_v46  ;;  %v763_v20 = vadd.f32 %v747_v31, %v683_v49 }
  0xd1   :  { %1667 = vmatpush.bf16.msra.mxu1 %v2976_v53  ;;  %v804_v53 = vperm.slane %v788_v1, 1 }
  0xd2   :  { %v619_v36 = vpop.f32.mrf.mxu2  ;;  %v593_v39 = vpop.f32.mrf.mxu0 }
  0xd3   :  { %v633_v37 = vpop.f32.mrf.mxu3  ;;  %v818_v12 = vmul.f32 %v802_v0, %v593_v39  ;;  %v607_v18 = vpop.f32.mrf.mxu1  ;;  %1679 = vmatpush.bf16.msra.mxu2 %v2964_v51  ;;  %v732_v11 = vmul.f32 %v724_v47, %v619_v36  ;;  %v812_v34 = vmul.f32 %v804_v53, %v619_v36  ;;  %v684_v17 = vmul.f32 %v676_v13, %v619_v36  ;;  %v3551_v13 = vld [vmem:[#allocation11_spill] sm:$0xff] }
  0xd4   :  { %v819_v27 = vmul.f32 %v803_v45, %v607_v18  ;;  %1692 = vmatpush.bf16.msra.mxu3 %v2982_v54  ;;  %1655 = vmatpush.bf16.msra.mxu0 %v2994_v56  ;;  %v733_v51 = vmul.f32 %v725_v21, %v633_v37  ;;  %v813_v29 = vmul.f32 %v805_v33, %v633_v37 }
  0xd5   :  { %v852_v15 = vrot.slane %v818_v12, 6  ;;  %1668 = vmatpush.bf16.msra.mxu1 %v3000_v57  ;;  %v886_v57 = vstv %s3347_s10  ;;  %v748_v30 = vrot.slane %v732_v11, 3  ;;  %v685_v26 = vmul.f32 %v677_v41, %v633_v37 }
  0xd6   :  { %v855_v6 = vrot.slane %v819_v27, 6  ;;  %v860_v48 = vrot.slane %v813_v29, 6  ;;  %v881_v47 = vmul.f32 %v880_v9, %v3301_v2  ;;  %v3549_v27 = vld [vmem:[#allocation6_spill] sm:$0xff] }
  0xd7   :  { %v853_v42 = vsel %vm838_vm6, %v851_v50, %v852_v15  ;;  %1680 = vmatpush.bf16.msra.mxu2 %v2988_v55  ;;  %v749_v55 = vrot.slane %v733_v51, 3  ;;  %v764_v46 = vadd.f32 %v748_v30, %v684_v17  ;;  %v3554_v17 = vld [vmem:[#allocation13_spill] sm:$0xff]  ;;  %v3555_v30 = vld [vmem:[#allocation14_spill] sm:$0xff] }
  0xd8   :  { %v875_v54 = vadd.f32 %v853_v42, %v762_v52  ;;  %v856_v56 = vsel %vm838_vm6, %v854_v19, %v855_v6  ;;  %1693 = vmatpush.bf16.msra.mxu3 %v3006_v58  ;;  %1656 = vmatpush.bf16.msra.mxu0 %v3018_v60  ;;  %v857_v58 = vrot.slane %v812_v34, 6  ;;  %v3548_v52 = vld [vmem:[#allocation8_spill] sm:$0xff]  ;;  %v3550_v19 = vld [vmem:[#allocation10_spill] sm:$0xff]  ;;  %v1604_v6 = vperm.slane %v2390_v38, 6 }
  0xd9   :  { %v876_v16 = vadd.f32 %v856_v56, %v763_v20  ;;  %1669 = vmatpush.bf16.msra.mxu1 %v3024_v61  ;;  %v765_v49 = vadd.f32 %v749_v55, %v685_v26  ;;  %v3552_v56 = vld [vmem:[#allocation12_spill] sm:$0xff] }
  0xda   :  { %v1045_v44 = vpack.c.bf16 %v875_v54, %v875_v54  ;;  %v621_v0 = vpop.f32.mrf.mxu2  ;;  %v887_v50 = vmul.f32 %v886_v57, %v875_v54 }
  0xdb   :  { %v1046_v45 = vpack.c.bf16 %v876_v16, %v876_v16  ;;  %v820_v24 = vmul.f32 %v804_v53, %v621_v0  ;;  %v635_v25 = vpop.f32.mrf.mxu3  ;;  %1681 = vmatpush.bf16.msra.mxu2 %v3012_v59  ;;  %v888_v8 = vmul.f32 %v886_v57, %v876_v16  ;;  %v882_v59 = vmul.f32 %v880_v9, %v3304_v23  ;;  %v3547_v23 = vld [vmem:[#allocation9_spill] sm:$0xff] }
  0xdc   :  { %v821_v14 = vmul.f32 %v805_v33, %v635_v25  ;;  %1694 = vmatpush.bf16.msra.mxu3 %v3030_v62  ;;  %1657 = vmatpush.bf16.msra.mxu0 %v3042_v3  ;;  %v1078_v60 = vshrl.u32 %v1045_v44, 16  ;;  %v1080_v61 = vshll.u32 %v1045_v44, 16  ;;  %v891_v42 = vadd.f32 %v887_v50, %v881_v47  ;;  %v3556_v44 = vld [vmem:[#allocation5_spill] sm:$0xff] }
  0xdd   :  { %v858_v43 = vrot.slane %v820_v24, 6  ;;  %1670 = vmatpush.bf16.msra.mxu1 %v3048_v4  ;;  %v1085_v22 = vshrl.u32 %v1046_v45, 16  ;;  %v1087_v10 = vshll.u32 %v1046_v45, 16  ;;  %v892_v39 = vadd.f32 %v888_v8, %v882_v59  ;;  %v3557_v24 = vld [vmem:[#allocation15_spill] sm:$0xff]  ;;  %v2391_v8 = vld [vmem:[%s3455_s0 + $0x8] sm:$0x77] }
  0xde   :  { %v861_v28 = vrot.slane %v821_v14, 6  ;;  %v1082_v1 = vrot.slane %v1080_v61, 1  ;;  %v3388_v0 = vadd.s32 6, %v3556_v44  ;;  %v1612_v25 = vperm.slane %v1604_v6, 2  ;;  %v3558_v14 = vld [vmem:[#allocation16_spill] sm:$0xff]  ;;  %v3560_v61 = vld [vmem:[#allocation18_spill] sm:$0xff] }
  0xdf   :  { %v859_v31 = vsel %vm838_vm6, %v857_v58, %v858_v43  ;;  %1682 = vmatpush.bf16.msra.mxu2 %v3036_v63  ;;  %v1089_v62 = vrot.slane %v1087_v10, 1  ;;  %v884_v63 = vmul.f32 %v880_v9, %v3316_v40  ;;  %v1603_v40 = vperm.slane %v2390_v38, 2  ;;  %v3565_v59 = vld [vmem:[#allocation23_spill] sm:$0xff]  ;;  %v3576_v50 = vld [vmem:[#allocation33_spill] sm:$0xff]  ;;  %v3581_v38 = vld [vmem:[#allocation38_spill] sm:$0xff] }
  0xe0   :  { %v877_v3 = vadd.f32 %v859_v31, %v764_v46  ;;  %v862_v36 = vsel %vm838_vm6, %v860_v48, %v861_v28  ;;  %1695 = vmatpush.bf16.msra.mxu3 %v3054_v5  ;;  %v1083_v4 = vor.u32 %v1082_v1, %v1078_v60  ;;  %1658 = vmatpush.bf16.msra.mxu0 %v3546_v32  ;;  %v899_v20 = vrot.slane %v892_v39, 7  ;;  %v3559_v60 = vld [vmem:[#allocation17_spill] sm:$0xff]  ;;  %v3562_v46 = vld [vmem:[#allocation20_spill] sm:$0xff]  ;;  %v3564_v28 = vld [vmem:[#allocation22_spill] sm:$0xff] }
  0xe1   :  { %v878_v7 = vadd.f32 %v862_v36, %v765_v49  ;;  %v1090_v37 = vor.u32 %v1089_v62, %v1085_v22  ;;  %1671 = vmatpush.bf16.msra.mxu1 %v3547_v23  ;;  %v1611_v29 = vperm.slane %v1603_v40, 2  ;;  %v1605_v43 = vperm.slane %v2391_v8, 2  ;;  %v3561_v22 = vld [vmem:[#allocation19_spill] sm:$0xff]  ;;  %v3563_v48 = vld [vmem:[#allocation21_spill] sm:$0xff]  ;;  %v3567_v62 = vld [vmem:[#allocation24_spill] sm:$0xff] }
  0xe2   :  { %v889_v21 = vmul.f32 %v886_v57, %v877_v3  ;;  %v1047_v12 = vpack.c.bf16 %v877_v3, %v877_v3  ;;  %1557 = vmatmul.bf16.vlgmr.msrb.gmra.mxu0 %v1083_v4  ;;  %v903_v26 = vsel %vm902_vm13, %v891_v42, %v899_v20  ;;  %vm1620_vm1 = vcmp.eq.s32.totalorder %v3388_v0, %v1612_v25  ;;  %v3568_v3 = vld [vmem:[#allocation25_spill] sm:$0xff]  ;;  %v3569_v36 = vld [vmem:[#allocation26_spill] sm:$0xff]  ;;  %v3570_v4 = vld [vmem:[#allocation27_spill] sm:$0xff] }
  0xe3   :  { %v890_v18 = vmul.f32 %v886_v57, %v878_v7  ;;  %v1048_v5 = vpack.c.bf16 %v878_v7, %v878_v7  ;;  %1570 = vmatmul.bf16.vlgmr.msrb.gmra.mxu1 %v1090_v37  ;;  %1683 = vmatpush.bf16.msra.mxu2 %v3549_v27  ;;  %v3553_v57 = vlaneseq  ;;  %vm1619_vm0 = vcmp.eq.s32.totalorder %v3388_v0, %v1611_v29  ;;  %vm2308_vm3 = vmpackc.low %vm1620_vm1, %vm1620_vm1  ;;  %v2392_v32 = vld [vmem:[%s3455_s0 + $0x10] sm:$0x77]  ;;  %v3571_v7 = vld [vmem:[#allocation28_spill] sm:$0xff] }
  0xe4   :  { %1703 = vmatpush.bf16.msrb.mxu0 %v3548_v52  ;;  %v893_v2 = vadd.f32 %v889_v21, %v883_v35  ;;  %1696 = vmatpush.bf16.msra.mxu3 %v3550_v19  ;;  %v1094_v53 = vshll.u32 %v1047_v12, 16  ;;  %v1092_v41 = vshrl.u32 %v1047_v12, 16  ;;  %v1606_v10 = vperm.slane %v2391_v8, 6  ;;  %vm2306_vm2 = vmpackc.low %vm1619_vm0, %vm1619_vm0  ;;  %v3572_v37 = vld [vmem:[#allocation29_spill] sm:$0xff]  ;;  %v3573_v23 = vld [vmem:[#allocation30_spill] sm:$0xff] }
  0xe5   :  { %v894_v15 = vadd.f32 %v890_v18, %v884_v63  ;;  %1716 = vmatpush.bf16.msrb.mxu1 %v3551_v13  ;;  %v1101_v11 = vshll.u32 %v1048_v5, 16  ;;  %v1099_v34 = vshrl.u32 %v1048_v5, 16  ;;  %vm910_vm15 = vcmp.lt.s32.totalorder %v3553_v57, 512  ;;  %v3574_v35 = vld [vmem:[#allocation31_spill] sm:$0xff]  ;;  %v3575_v12 = vld [vmem:[#allocation32_spill] sm:$0xff]  ;;  %v3577_v18 = vld [vmem:[#allocation34_spill] sm:$0xff] }
  0xe6   :  { %v900_v33 = vrot.slane %v893_v2, 6  ;;  %v1096_v51 = vrot.slane %v1094_v53, 1  ;;  %v1613_v1 = vperm.slane %v1605_v43, 2  ;;  %v1614_v49 = vperm.slane %v1606_v10, 2  ;;  %v2393_v5 = vld [vmem:[%s3455_s0 + $0x18] sm:$0x77] }
  0xe7   :  { %v901_v54 = vrot.slane %v894_v15, 5  ;;  %v1103_v9 = vrot.slane %v1101_v11, 1  ;;  %1684 = vmatpush.bf16.msra.mxu2 %v3554_v17  ;;  %v3566_v31 = vmov 1.0|1.0   ;;  %v1607_v47 = vperm.slane %v2392_v32, 2  ;;  %v3578_v2 = vld [vmem:[#allocation35_spill] sm:$0xff] }
  0xe8   :  { %1704 = vmatpush.bf16.msrb.mxu0 %v3552_v56  ;;  %v1097_v16 = vor.u32 %v1096_v51, %v1092_v41  ;;  %1697 = vmatpush.bf16.msra.mxu3 %v3555_v30  ;;  %vm1621_vm4 = vcmp.eq.s32.totalorder %v3388_v0, %v1613_v1  ;;  %vm1622_vm5 = vcmp.eq.s32.totalorder %v3388_v0, %v1614_v49  ;;  %v1608_v39 = vperm.slane %v2392_v32, 6  ;;  %v3579_v19 = vld [vmem:[#allocation36_spill] sm:$0xff]  ;;  %v3580_v53 = vld [vmem:[#allocation37_spill] sm:$0xff]  ;;  %v3582_v20 = vld [vmem:[#allocation39_spill] sm:$0xff] }
  0xe9   :  { %v905_v55 = vsel %vm904_vm14, %v900_v33, %v901_v54  ;;  %v1104_v45 = vor.u32 %v1103_v9, %v1099_v34  ;;  %1717 = vmatpush.bf16.msrb.mxu1 %v3557_v24  ;;  %vm2312_vm7 = vmpackc.low %vm1622_vm5, %vm1622_vm5  ;;  %v1615_v63 = vperm.slane %v1607_v47, 2  ;;  %v1609_v52 = vperm.slane %v2393_v5, 2  ;;  %v3583_v13 = vld [vmem:[#allocation40_spill] sm:$0xff]  ;;  %v3584_v11 = vld [vmem:[#allocation41_spill] sm:$0xff] }
  0xea   :  { %v906_v58 = vsel %vm838_vm6, %v903_v26, %v905_v55  ;;  %1583 = vmatmul.bf16.vlgmr.msrb.gmra.mxu2 %v1097_v16  ;;  %vm2310_vm6 = vmpackc.low %vm1621_vm4, %vm1621_vm4  ;;  %v1616_v21 = vperm.slane %v1608_v39, 2  ;;  %v1610_v27 = vperm.slane %v2393_v5, 6  ;;  %v3585_v6 = vld [vmem:[#allocation42_spill] sm:$0xff]  ;;  %v3586_v33 = vld [vmem:[#allocation43_spill] sm:$0xff] }
  0xeb   :  { %912 = vst.msk [vmem:[%s3459_s4] sm:$0xf] %vm910_vm15, %v906_v58  ;;  %1596 = vmatmul.bf16.vlgmr.msrb.gmra.mxu3 %v1104_v45  ;;  %1729 = vmatpush.bf16.msrb.mxu2 %v3558_v14  ;;  %vm1623_vm8 = vcmp.eq.s32.totalorder %v3388_v0, %v1615_v63  ;;  %v1617_v40 = vperm.slane %v1609_v52, 2 }
  0xec   :  { %1742 = vmatpush.bf16.msrb.mxu3 %v3559_v60  ;;  %1705 = vmatpush.bf16.msrb.mxu0 %v3560_v61  ;;  %vm1624_vm9 = vcmp.eq.s32.totalorder %v3388_v0, %v1616_v21  ;;  %vm2314_vm10 = vmpackc.low %vm1623_vm8, %vm1623_vm8  ;;  %v1618_v15 = vperm.slane %v1610_v27, 2 }
  0xed   :  { %1718 = vmatpush.bf16.msrb.mxu1 %v3561_v22  ;;  %vm2316_vm11 = vmpackc.low %vm1624_vm9, %vm1624_vm9  ;;  %vm1625_vm12 = vcmp.eq.s32.totalorder %v3388_v0, %v1617_v40 }
  0xee   :  { %vm1626_vm13 = vcmp.eq.s32.totalorder %v3388_v0, %v1618_v15  ;;  %vm2318_vm14 = vmpackc.low %vm1625_vm12, %vm1625_vm12 }
  0xef   :  { %1730 = vmatpush.bf16.msrb.mxu2 %v3562_v46  ;;  %vm2320_vm15 = vmpackc.low %vm1626_vm13, %vm1626_vm13 }
  0xf0   :  { %1743 = vmatpush.bf16.msrb.mxu3 %v3563_v48  ;;  %1706 = vmatpush.bf16.msrb.mxu0 %v3564_v28 }
  0xf1   :  { %1719 = vmatpush.bf16.msrb.mxu1 %v3565_v59 }
  0xf2   :  { %2307 = vmatmul.msk.bf16.vlgmr.msra.gmra.mxu0 %vm2306_vm2, %v3566_v31 }
  0xf3   :  { %1731 = vmatpush.bf16.msrb.mxu2 %v3567_v62  ;;  %2309 = vmatmul.msk.bf16.vlgmr.msra.gmra.mxu1 %vm2308_vm3, %v3566_v31 }
  0xf4   :  { %1744 = vmatpush.bf16.msrb.mxu3 %v3568_v3  ;;  %1707 = vmatpush.bf16.msrb.mxu0 %v3569_v36 }
  0xf5   :  { %1720 = vmatpush.bf16.msrb.mxu1 %v3570_v4 }
  0xf7   :  { %1732 = vmatpush.bf16.msrb.mxu2 %v3571_v7 }
  0xf8   :  { %1745 = vmatpush.bf16.msrb.mxu3 %v3572_v37  ;;  %1708 = vmatpush.bf16.msrb.mxu0 %v3573_v23 }
  0xf9   :  { %1721 = vmatpush.bf16.msrb.mxu1 %v3574_v35 }
  0xfa   :  { %2311 = vmatmul.msk.bf16.vlgmr.msra.gmra.mxu2 %vm2310_vm6, %v3566_v31 }
  0xfb   :  { %2313 = vmatmul.msk.bf16.vlgmr.msra.gmra.mxu3 %vm2312_vm7, %v3566_v31  ;;  %1733 = vmatpush.bf16.msrb.mxu2 %v3575_v12 }
  0xfc   :  { %1746 = vmatpush.bf16.msrb.mxu3 %v3576_v50  ;;  %1709 = vmatpush.bf16.msrb.mxu0 %v3577_v18 }
  0xfd   :  { %1722 = vmatpush.bf16.msrb.mxu1 %v3578_v2 }
  0xff   :  { %1734 = vmatpush.bf16.msrb.mxu2 %v3579_v19 }
 0x100   :  { %1747 = vmatpush.bf16.msrb.mxu3 %v3580_v53  ;;  %1710 = vmatpush.bf16.msrb.mxu0 %v3581_v38 }
 0x101   :  { %1723 = vmatpush.bf16.msrb.mxu1 %v3582_v20 }
 0x103   :  { %1735 = vmatpush.bf16.msrb.mxu2 %v3583_v13  ;;  %2315 = vmatmul.msk.bf16.vlgmr.msrb.gmra.mxu0 %vm2314_vm10, %v3566_v31 }
 0x104   :  { %1748 = vmatpush.bf16.msrb.mxu3 %v3584_v11  ;;  %2317 = vmatmul.msk.bf16.vlgmr.msrb.gmra.mxu1 %vm2316_vm11, %v3566_v31 }
 0x107   :  { %1736 = vmatpush.bf16.msrb.mxu2 %v3585_v6 }
 0x108   :  { %1749 = vmatpush.bf16.msrb.mxu3 %v3586_v33 }
 0x10a   :  { %2319 = vmatmul.msk.bf16.vlgmr.msrb.gmra.mxu2 %vm2318_vm14, %v3566_v31 }
 0x10b   :  { %2321 = vmatmul.msk.bf16.vlgmr.msrb.gmra.mxu3 %vm2320_vm15, %v3566_v31 }
 0x13f   :  { %v1506_v41 = vpop.f32.mrf.mxu0 }
 0x140   :  { %v1519_v51 = vpop.f32.mrf.mxu1 }
 0x141   :  { %v1520_v17 = vadd.f32 %v1519_v51, %v1506_v41 }
 0x147   :  { %v1508_v42 = vpop.f32.mrf.mxu0 }
 0x148   :  { %v1521_v54 = vpop.f32.mrf.mxu1 }
 0x14d   :  { %v1532_v56 = vpop.f32.mrf.mxu2 }
 0x14e   :  { %v1545_v34 = vpop.f32.mrf.mxu3  ;;  %v1533_v44 = vadd.f32 %v1532_v56, %v1520_v17 }
 0x150   :  { %v1546_v0 = vadd.f32 %v1545_v34, %v1533_v44 }
 0x155   :  { %v1534_v9 = vpop.f32.mrf.mxu2 }
 0x156   :  { %v1547_v57 = vpop.f32.mrf.mxu3 }
 0x15f   :  { %v1558_v16 = vpop.f32.mrf.mxu0 }
 0x160   :  { %v1571_v30 = vpop.f32.mrf.mxu1  ;;  %v1559_v26 = vadd.f32 %v1558_v16, %v1546_v0 }
 0x162   :  { %v1572_v45 = vadd.f32 %v1571_v30, %v1559_v26 }
 0x167   :  { %v1560_v29 = vpop.f32.mrf.mxu0 }
 0x168   :  { %v1573_v55 = vpop.f32.mrf.mxu1 }
 0x16d   :  { %v1584_v24 = vpop.f32.mrf.mxu2 }
 0x16e   :  { %v1585_v25 = vadd.f32 %v1584_v24, %v1572_v45  ;;  %v1597_v58 = vpop.f32.mrf.mxu3 }
 0x16f   :  { %v1660_v14 = vpop.f32.mrf.mxu0 }
 0x170   :  { %v1598_v60 = vadd.f32 %v1597_v58, %v1585_v25  ;;  %v1673_v61 = vpop.f32.mrf.mxu1 }
 0x171   :  { %v1674_v46 = vadd.f32 %v1673_v61, %v1660_v14 }
 0x172   :  { %1601 = vst [vmem:[%s3460_s5] sm:$0x3] %v1598_v60 }
 0x175   :  { %v1586_v8 = vpop.f32.mrf.mxu2 }
 0x176   :  { %v1599_v43 = vpop.f32.mrf.mxu3 }
 0x177   :  { %v1662_v22 = vpop.f32.mrf.mxu0 }
 0x178   :  { %v1675_v10 = vpop.f32.mrf.mxu1 }
 0x17d   :  { %v1686_v48 = vpop.f32.mrf.mxu2 }
 0x17e   :  { %v1699_v28 = vpop.f32.mrf.mxu3  ;;  %v1687_v1 = vadd.f32 %v1686_v48, %v1674_v46 }
 0x180   :  { %v1712_v59 = vpop.f32.mrf.mxu0  ;;  %v1700_v31 = vadd.f32 %v1699_v28, %v1687_v1 }
 0x181   :  { %v1725_v49 = vpop.f32.mrf.mxu1 }
 0x182   :  { %v1713_v36 = vadd.f32 %v1712_v59, %v1700_v31 }
 0x184   :  { %v1726_v47 = vadd.f32 %v1725_v49, %v1713_v36 }
 0x185   :  { %v1688_v62 = vpop.f32.mrf.mxu2 }
 0x186   :  { %v1701_v3 = vpop.f32.mrf.mxu3 }
 0x188   :  { %v1714_v4 = vpop.f32.mrf.mxu0 }
 0x189   :  { %v1727_v32 = vpop.f32.mrf.mxu1 }
 0x18d   :  { %v1738_v39 = vpop.f32.mrf.mxu2 }
 0x18e   :  { %v1739_v7 = vadd.f32 %v1738_v39, %v1726_v47  ;;  %v1751_v37 = vpop.f32.mrf.mxu3 }
 0x190   :  { %v1752_v23 = vadd.f32 %v1751_v37, %v1739_v7 }
 0x192   :  { %1755 = vst [vmem:[%s3461_s6] sm:$0xff] %v1752_v23 }
 0x195   :  { %v1740_v35 = vpop.f32.mrf.mxu2 }
 0x196   :  { %v1753_v63 = vpop.f32.mrf.mxu3 }
 0x197   :  { %1768 = vsyncpa [#allocation3], 1 }

</bundles_post_ra>
